<compile_context>
chip_gen: v7x
topology: tpu7x:2x2x1
jax: 0.10.0
libtpu: 0.0.40
codegen_flags: <defaults>
</compile_context>

<pallas_src>
import functools

import jax
import jax.numpy as jnp
from jax.experimental import pallas as pl
from jax.experimental.pallas import tpu as pltpu


def _round_up(x, m):
    return (x + m - 1) // m * m


def _nbytes(a):
    return a.size * a.dtype.itemsize


# ----------------------------------------------------------------------------
# Single fused Generator-forward kernel (no grid; everything in VMEM, with the
# large head weights DMA'd manually so their transfer overlaps conv compute).
# ----------------------------------------------------------------------------
def _generator_kernel(x_ref, *refs, n_conv, bn_eps, neg_slope,
                      hidden, na_pad, nb_pad):
    """Fused forward.

    Ref layout after x_ref:
      refs[0:n_conv]       conv-layer weights (bf16), (K_i, C_i)           [VMEM]
      refs[n_conv + 0]     merged head fc1 bias (f32), (1, 2*H)            [VMEM]
      refs[n_conv + 1]     lane-padded fc2 bias (f32), (1, na_pad+nb_pad)  [VMEM]
      refs[n_conv + 2]     merged head fc1 weight (bf16), (C_last, 2*H)    [HBM]
      refs[n_conv + 3]     atom fc2 weight (bf16), (H, na_pad)             [HBM]
      refs[n_conv + 4]     bond fc2 weight (bf16, symmetrized), (H, nb_pad)[HBM]
      refs[n_conv + 5]     output (f32), (B, na_pad + nb_pad)
      refs[n_conv + 6..9]  VMEM scratch for the 3 head weights + DMA sems
    """
    conv_ws = refs[:n_conv]
    fc1_b, fc2_b, fc1_hbm, a2_hbm, b2_hbm = refs[n_conv:n_conv + 5]
    o_ref = refs[n_conv + 5]
    fc1_buf, a2_buf, b2_buf, sems = refs[n_conv + 6:n_conv + 10]

    # Kick off the large head-weight DMAs immediately so they overlap the
    # conv/BN/LeakyReLU stack (a gridless pallas_call would otherwise
    # serialize all prologue input DMAs before any compute).
    cp_fc1 = pltpu.make_async_copy(fc1_hbm, fc1_buf, sems.at[0])
    cp_a2 = pltpu.make_async_copy(a2_hbm, a2_buf, sems.at[1])
    cp_b2 = pltpu.make_async_copy(b2_hbm, b2_buf, sems.at[2])
    cp_fc1.start()
    cp_a2.start()
    cp_b2.start()

    h = x_ref[...]                       # (B, K0) f32
    inv_b = 1.0 / h.shape[0]

    # Conv stack: Linear (bias cancelled by BN) -> BatchNorm1d(train, eps=0.8)
    # -> LeakyReLU(0.2).  Single-pass batch statistics (biased variance),
    # gamma=1 / beta=0 (fresh-init module).
    for li in range(n_conv):
        z = jnp.dot(h.astype(jnp.bfloat16), conv_ws[li][...],
                    preferred_element_type=jnp.float32)
        mean = jnp.sum(z, axis=0, keepdims=True) * inv_b
        ex2 = jnp.sum(z * z, axis=0, keepdims=True) * inv_b
        var = jnp.maximum(ex2 - mean * mean, 0.0)   # guard cancellation
        z = (z - mean) * jax.lax.rsqrt(var + bn_eps)
        h = jnp.where(z > 0, z, neg_slope * z)

    # Merged atom/bond fc1 (shared input): Linear + bias -> LeakyReLU.
    cp_fc1.wait()
    g = jnp.dot(h.astype(jnp.bfloat16), fc1_buf[...],
                preferred_element_type=jnp.float32) + fc1_b[...]
    g = jnp.where(g > 0, g, neg_slope * g).astype(jnp.bfloat16)

    # Atom head fc2 (output columns padded to a 128 multiple -> unmasked
    # lane-dense stores).
    cp_a2.wait()
    ya = jnp.dot(g[:, :hidden], a2_buf[...],
                 preferred_element_type=jnp.float32) + fc2_b[:, :na_pad]
    o_ref[:, :na_pad] = ya.astype(o_ref.dtype)

    # Bond head fc2 — symmetrization is already folded into the weights/bias.
    cp_b2.wait()
    yb = jnp.dot(g[:, hidden:], b2_buf[...],
                 preferred_element_type=jnp.float32) + fc2_b[:, na_pad:]
    o_ref[:, na_pad:] = yb.astype(o_ref.dtype)


# ----------------------------------------------------------------------------
# Parameter init (deterministic, PyTorch nn.Linear-style uniform init)
# ----------------------------------------------------------------------------
def _init_linear(key, fan_in, fan_out, dtype=jnp.float32):
    kw, kb = jax.random.split(key)
    bound = 1.0 / (fan_in ** 0.5)
    w = jax.random.uniform(kw, (fan_in, fan_out), dtype, -bound, bound)
    b = jax.random.uniform(kb, (fan_out,), dtype, -bound, bound)
    return w, b


def init_generator_params(key, x_dim, z_dim, conv_dims,
                          ligand_size, n_atom_types, n_bond_types):
    dims = [x_dim + z_dim] + list(conv_dims)
    keys = jax.random.split(key, len(conv_dims) + 4)
    params = {"layers": []}
    for i, (c0, c1) in enumerate(zip(dims[:-1], dims[1:])):
        # Conv-layer biases are initialized for fidelity but unused: they are
        # cancelled exactly by the following BatchNorm's mean subtraction.
        params["layers"].append(_init_linear(keys[i], c0, c1))
    k = len(conv_dims)
    params["atom_fc1"] = _init_linear(keys[k + 0], conv_dims[-1], 2048)
    params["atom_fc2"] = _init_linear(keys[k + 1], 2048,
                                      ligand_size * n_atom_types)
    params["bond_fc1"] = _init_linear(keys[k + 2], conv_dims[-1], 2048)
    params["bond_fc2"] = _init_linear(keys[k + 3], 2048,
                                      ligand_size * ligand_size * n_bond_types)
    return params


def pack_generator_params(params, *, ligand_size, n_atom_types, n_bond_types):
    """One-time repack of params into the kernel-ready fused/bf16 layout."""
    conv_ws = tuple(w.astype(jnp.bfloat16) for (w, _b) in params["layers"])

    a1_w, a1_b = params["atom_fc1"]
    b1_w, b1_b = params["bond_fc1"]
    a2_w, a2_b = params["atom_fc2"]
    b2_w, b2_b = params["bond_fc2"]
    H = a1_w.shape[1]                                   # 2048
    L, A, T = ligand_size, n_atom_types, n_bond_types

    na = L * A
    nb = L * L * T
    na_pad = _round_up(na, 128)
    nb_pad = _round_up(nb, 128)

    # Merged head fc1 (shared input): (C_last, 2H).
    fc1_w = jnp.concatenate([a1_w, b1_w], axis=1).astype(jnp.bfloat16)
    fc1_b = jnp.concatenate([a1_b, b1_b], axis=0).reshape(1, 2 * H)
    fc1_b = fc1_b.astype(jnp.float32)

    # Fold the bond symmetrization (bonds + bonds^T)/2 into the bond-head
    # weights/bias.  Exact: the head is linear and the Dropouts are identity.
    perm = jnp.arange(nb).reshape(L, L, T).transpose(1, 0, 2).reshape(nb)
    b2_w_sym = 0.5 * (b2_w + b2_w[:, perm])
    b2_b_sym = 0.5 * (b2_b + b2_b[perm])

    # Separate, lane-padded fc2 weights (no zero off-diagonal block).
    a2_w_p = jnp.zeros((H, na_pad), jnp.float32).at[:, :na].set(a2_w)
    a2_w_p = a2_w_p.astype(jnp.bfloat16)
    b2_w_p = jnp.zeros((H, nb_pad), jnp.float32).at[:, :nb].set(b2_w_sym)
    b2_w_p = b2_w_p.astype(jnp.bfloat16)
    fc2_b = jnp.zeros((1, na_pad + nb_pad), jnp.float32)
    fc2_b = fc2_b.at[0, :na].set(a2_b)
    fc2_b = fc2_b.at[0, na_pad:na_pad + nb].set(b2_b_sym)

    return {"conv_ws": conv_ws, "fc1_w": fc1_w, "fc1_b": fc1_b,
            "a2_w": a2_w_p, "b2_w": b2_w_p, "fc2_b": fc2_b}


# ----------------------------------------------------------------------------
# Generator forward pass (single pallas_call)
# ----------------------------------------------------------------------------
def generator_forward(packed, z, x, *, ligand_size, n_atom_types, n_bond_types):
    if x is not None:                       # self.x_dim truthy
        gen_input = jnp.concatenate([x, z], axis=-1)
    else:
        gen_input = z
    gen_input = gen_input.astype(jnp.float32)
    B = gen_input.shape[0]

    conv_ws = packed["conv_ws"]
    n_conv = len(conv_ws)
    fc1_w, fc1_b = packed["fc1_w"], packed["fc1_b"]
    a2_w, b2_w, fc2_b = packed["a2_w"], packed["b2_w"], packed["fc2_b"]
    H = fc1_w.shape[1] // 2

    na = ligand_size * n_atom_types
    nb = ligand_size * ligand_size * n_bond_types
    na_pad = _round_up(na, 128)
    nb_pad = _round_up(nb, 128)
    n_out = na_pad + nb_pad

    kernel = functools.partial(_generator_kernel, n_conv=n_conv, bn_eps=0.8,
                               neg_slope=0.2, hidden=H, na_pad=na_pad,
                               nb_pad=nb_pad)
    vmem = pl.BlockSpec(memory_space=pltpu.MemorySpace.VMEM)
    hbm = pl.BlockSpec(memory_space=pl.ANY)

    # Advisory cost estimate so XLA can schedule the surrounding concat /
    # reshape ops around the custom call instead of serializing on it.
    dims = [int(gen_input.shape[1])] + [int(w.shape[1]) for w in conv_ws]
    flops = sum(2 * B * k * n for k, n in zip(dims[:-1], dims[1:]))
    flops += 2 * B * dims[-1] * (2 * H) + 2 * B * H * n_out
    weight_bytes = (sum(_nbytes(w) for w in conv_ws) + _nbytes(fc1_w)
                    + _nbytes(a2_w) + _nbytes(b2_w)
                    + _nbytes(fc1_b) + _nbytes(fc2_b))
    bytes_accessed = weight_bytes + _nbytes(gen_input) + B * n_out * 4
    cost = pl.CostEstimate(flops=flops, transcendentals=sum(dims[1:]),
                           bytes_accessed=bytes_accessed)

    # All weights + scratch + activations stay resident in VMEM.  Set an
    # explicit scoped-VMEM limit with headroom so larger conv_dims (toward
    # 2048) don't hit the v5e 16 MiB default cliff; v7x physical VMEM is only
    # 64 MiB, so the cap stays well below that.
    # TODO(synk): if total weights approach ~48 MiB, switch the head matmuls
    # to a K-reduction grid with BlockSpec pipelining instead of residency.
    resident = weight_bytes + _nbytes(gen_input) + B * n_out * 4
    vmem_limit = int(min(max(2 * resident + (4 << 20), 16 << 20), 48 << 20))

    out = pl.pallas_call(
        kernel,
        out_shape=jax.ShapeDtypeStruct((B, n_out), jnp.float32),
        in_specs=[vmem] * (1 + n_conv + 2) + [hbm] * 3,
        out_specs=vmem,
        scratch_shapes=[
            pltpu.VMEM(fc1_w.shape, jnp.bfloat16),
            pltpu.VMEM(a2_w.shape, jnp.bfloat16),
            pltpu.VMEM(b2_w.shape, jnp.bfloat16),
            pltpu.SemaphoreType.DMA((3,)),
        ],
        compiler_params=pltpu.CompilerParams(vmem_limit_bytes=vmem_limit),
        cost_estimate=cost,
    )(gen_input, *conv_ws, fc1_b, fc2_b, fc1_w, a2_w, b2_w)

    atoms = out[:, :na].reshape(-1, ligand_size, n_atom_types)
    # Symmetrization already folded into the bond weights; just slice/reshape.
    bonds = out[:, na_pad:na_pad + nb].reshape(
        -1, ligand_size, ligand_size, n_bond_types)
    return atoms, bonds


# ----------------------------------------------------------------------------
# Pure-JAX reference mirroring the kernel's numerics (for a correctness check)
# ----------------------------------------------------------------------------
def _reference_forward(packed, z, x, *, ligand_size, n_atom_types,
                       n_bond_types):
    gen_input = jnp.concatenate([x, z], axis=-1) if x is not None else z
    h = gen_input.astype(jnp.float32)
    for w in packed["conv_ws"]:
        t = jnp.dot(h.astype(jnp.bfloat16), w,
                    preferred_element_type=jnp.float32)
        mean = jnp.mean(t, axis=0, keepdims=True)
        var = jnp.maximum(jnp.mean(t * t, axis=0, keepdims=True)
                          - mean * mean, 0.0)
        t = (t - mean) * jax.lax.rsqrt(var + 0.8)
        h = jnp.where(t > 0, t, 0.2 * t)
    g = jnp.dot(h.astype(jnp.bfloat16), packed["fc1_w"],
                preferred_element_type=jnp.float32) + packed["fc1_b"]
    g = jnp.where(g > 0, g, 0.2 * g).astype(jnp.bfloat16)
    H = packed["fc1_w"].shape[1] // 2
    na = ligand_size * n_atom_types
    nb = ligand_size * ligand_size * n_bond_types
    na_pad = _round_up(na, 128)
    ya = jnp.dot(g[:, :H], packed["a2_w"],
                 preferred_element_type=jnp.float32) + packed["fc2_b"][:, :na_pad]
    yb = jnp.dot(g[:, H:], packed["b2_w"],
                 preferred_element_type=jnp.float32) + packed["fc2_b"][:, na_pad:]
    atoms = ya[:, :na].reshape(-1, ligand_size, n_atom_types)
    bonds = yb[:, :nb].reshape(-1, ligand_size, ligand_size, n_bond_types)
    return atoms, bonds


# ----------------------------------------------------------------------------
if __name__ == "__main__":
    # Small shapes consistent with the module.
    x_dim, z_dim = 8, 8
    conv_dims = [32, 64]
    ligand_size, n_atom_types, n_bond_types = 8, 8, 4
    batch = 8

    key = jax.random.PRNGKey(0)
    kp, kz, kx = jax.random.split(key, 3)

    params = init_generator_params(kp, x_dim, z_dim, conv_dims,
                                   ligand_size, n_atom_types, n_bond_types)
    packed = pack_generator_params(params, ligand_size=ligand_size,
                                   n_atom_types=n_atom_types,
                                   n_bond_types=n_bond_types)
    z = jax.random.normal(kz, (batch, z_dim), jnp.float32)
    x = jax.random.normal(kx, (batch, x_dim), jnp.float32)

    fwd = jax.jit(functools.partial(generator_forward,
                                    ligand_size=ligand_size,
                                    n_atom_types=n_atom_types,
                                    n_bond_types=n_bond_types))
    atoms, bonds = fwd(packed, z, x)
    jax.block_until_ready((atoms, bonds))

    assert atoms.shape == (batch, ligand_size, n_atom_types)
    assert bonds.shape == (batch, ligand_size, ligand_size, n_bond_types)

    ref_atoms, ref_bonds = _reference_forward(
        packed, z, x, ligand_size=ligand_size,
        n_atom_types=n_atom_types, n_bond_types=n_bond_types)
    assert bool(jnp.allclose(atoms, ref_atoms, atol=2e-2, rtol=2e-2))
    assert bool(jnp.allclose(bonds, ref_bonds, atol=2e-2, rtol=2e-2))
    # The folded symmetrization must make bonds symmetric over (i, j).
    assert bool(jnp.allclose(bonds, jnp.transpose(bonds, (0, 2, 1, 3)),
                             atol=1e-5, rtol=1e-5))

    print("KERNEL_OK")
</pallas_src>

<mosaic_0001>
module attributes {stable_mosaic.version = 11 : i64} {
  func.func @_generator_kernel(%arg0: memref<8x16xf32, #tpu.memory_space<vmem>>, %arg1: memref<16x32xbf16, #tpu.memory_space<vmem>>, %arg2: memref<32x64xbf16, #tpu.memory_space<vmem>>, %arg3: memref<1x4096xf32, #tpu.memory_space<vmem>>, %arg4: memref<1x384xf32, #tpu.memory_space<vmem>>, %arg5: memref<64x4096xbf16, #tpu.memory_space<any>>, %arg6: memref<2048x128xbf16, #tpu.memory_space<any>>, %arg7: memref<2048x256xbf16, #tpu.memory_space<any>>, %arg8: memref<8x384xf32, #tpu.memory_space<vmem>>, %arg9: memref<64x4096xbf16, #tpu.memory_space<vmem>>, %arg10: memref<2048x128xbf16, #tpu.memory_space<vmem>>, %arg11: memref<2048x256xbf16, #tpu.memory_space<vmem>>, %arg12: memref<3x!tpu.dma_semaphore, #tpu.memory_space<semaphore_mem>>) attributes {dimension_semantics = [], scalar_prefetch = 0 : i64, scratch_operands = 4 : i64, tpu.core_type = #tpu.core_type<tc>} {
    %c0_i32 = arith.constant 0 : i32
    %0 = tpu.memref_slice %arg12[%c0_i32] : memref<3x!tpu.dma_semaphore, #tpu.memory_space<semaphore_mem>> -> memref<1x!tpu.dma_semaphore, #tpu.memory_space<semaphore_mem>>
    %1 = tpu.memref_squeeze %0 : memref<1x!tpu.dma_semaphore, #tpu.memory_space<semaphore_mem>> -> memref<!tpu.dma_semaphore, #tpu.memory_space<semaphore_mem>>
    tpu.enqueue_dma source(%arg5 : memref<64x4096xbf16, #tpu.memory_space<any>>) target(%arg9 : memref<64x4096xbf16, #tpu.memory_space<vmem>>) target_semaphore(%1 : memref<!tpu.dma_semaphore, #tpu.memory_space<semaphore_mem>>)
    %c1_i32 = arith.constant 1 : i32
    %2 = tpu.memref_slice %arg12[%c1_i32] : memref<3x!tpu.dma_semaphore, #tpu.memory_space<semaphore_mem>> -> memref<1x!tpu.dma_semaphore, #tpu.memory_space<semaphore_mem>>
    %3 = tpu.memref_squeeze %2 : memref<1x!tpu.dma_semaphore, #tpu.memory_space<semaphore_mem>> -> memref<!tpu.dma_semaphore, #tpu.memory_space<semaphore_mem>>
    tpu.enqueue_dma source(%arg6 : memref<2048x128xbf16, #tpu.memory_space<any>>) target(%arg10 : memref<2048x128xbf16, #tpu.memory_space<vmem>>) target_semaphore(%3 : memref<!tpu.dma_semaphore, #tpu.memory_space<semaphore_mem>>)
    %c2_i32 = arith.constant 2 : i32
    %4 = tpu.memref_slice %arg12[%c2_i32] : memref<3x!tpu.dma_semaphore, #tpu.memory_space<semaphore_mem>> -> memref<1x!tpu.dma_semaphore, #tpu.memory_space<semaphore_mem>>
    %5 = tpu.memref_squeeze %4 : memref<1x!tpu.dma_semaphore, #tpu.memory_space<semaphore_mem>> -> memref<!tpu.dma_semaphore, #tpu.memory_space<semaphore_mem>>
    tpu.enqueue_dma source(%arg7 : memref<2048x256xbf16, #tpu.memory_space<any>>) target(%arg11 : memref<2048x256xbf16, #tpu.memory_space<vmem>>) target_semaphore(%5 : memref<!tpu.dma_semaphore, #tpu.memory_space<semaphore_mem>>)
    %c0 = arith.constant 0 : index
    %c0_0 = arith.constant 0 : index
    %6 = vector.load %arg0[%c0, %c0_0] : memref<8x16xf32, #tpu.memory_space<vmem>>, vector<8x16xf32>
    %7 = arith.truncf %6 : vector<8x16xf32> to vector<8x16xbf16>
    %c0_1 = arith.constant 0 : index
    %c0_2 = arith.constant 0 : index
    %8 = vector.load %arg1[%c0_1, %c0_2] : memref<16x32xbf16, #tpu.memory_space<vmem>>, vector<16x32xbf16>
    %cst = arith.constant dense<0.000000e+00> : vector<8x32xf32>
    %9 = tpu.matmul %7, %8, %cst {dimension_numbers = #tpu.dot_dimension_numbers<[1], [0], [0], [1], [0, 0, 1, 1], [], []>} : vector<8x16xbf16>, vector<16x32xbf16>, vector<8x32xf32> -> vector<8x32xf32>
    %cst_3 = arith.constant dense<0.000000e+00> : vector<32xf32>
    %10 = vector.multi_reduction <add>, %9, %cst_3 [0] : vector<8x32xf32> to vector<32xf32>
    %11 = vector.shape_cast %10 : vector<32xf32> to vector<1x32xf32>
    %cst_4 = arith.constant 1.250000e-01 : f32
    %12 = vector.broadcast %cst_4 : f32 to vector<1x32xf32>
    %13 = arith.mulf %11, %12 : vector<1x32xf32>
    %14 = arith.mulf %9, %9 : vector<8x32xf32>
    %cst_5 = arith.constant dense<0.000000e+00> : vector<32xf32>
    %15 = vector.multi_reduction <add>, %14, %cst_5 [0] : vector<8x32xf32> to vector<32xf32>
    %16 = vector.shape_cast %15 : vector<32xf32> to vector<1x32xf32>
    %cst_6 = arith.constant 1.250000e-01 : f32
    %17 = vector.broadcast %cst_6 : f32 to vector<1x32xf32>
    %18 = arith.mulf %16, %17 : vector<1x32xf32>
    %19 = arith.mulf %13, %13 : vector<1x32xf32>
    %20 = arith.subf %18, %19 : vector<1x32xf32>
    %cst_7 = arith.constant 0.000000e+00 : f32
    %21 = vector.broadcast %cst_7 : f32 to vector<1x32xf32>
    %22 = arith.maximumf %20, %21 : vector<1x32xf32>
    %23 = vector.broadcast %13 : vector<1x32xf32> to vector<8x32xf32>
    %24 = arith.subf %9, %23 : vector<8x32xf32>
    %cst_8 = arith.constant 8.000000e-01 : f32
    %25 = vector.broadcast %cst_8 : f32 to vector<1x32xf32>
    %26 = arith.addf %22, %25 : vector<1x32xf32>
    %27 = math.rsqrt %26 : vector<1x32xf32>
    %28 = vector.broadcast %27 : vector<1x32xf32> to vector<8x32xf32>
    %29 = arith.mulf %24, %28 : vector<8x32xf32>
    %cst_9 = arith.constant 0.000000e+00 : f32
    %30 = vector.broadcast %cst_9 : f32 to vector<8x32xf32>
    %31 = arith.cmpf ogt, %29, %30 : vector<8x32xf32>
    %cst_10 = arith.constant 2.000000e-01 : f32
    %32 = vector.broadcast %cst_10 : f32 to vector<8x32xf32>
    %33 = arith.mulf %32, %29 : vector<8x32xf32>
    %34 = arith.select %31, %29, %33 : vector<8x32xi1>, vector<8x32xf32>
    %35 = arith.truncf %34 : vector<8x32xf32> to vector<8x32xbf16>
    %c0_11 = arith.constant 0 : index
    %c0_12 = arith.constant 0 : index
    %36 = vector.load %arg2[%c0_11, %c0_12] : memref<32x64xbf16, #tpu.memory_space<vmem>>, vector<32x64xbf16>
    %cst_13 = arith.constant dense<0.000000e+00> : vector<8x64xf32>
    %37 = tpu.matmul %35, %36, %cst_13 {dimension_numbers = #tpu.dot_dimension_numbers<[1], [0], [0], [1], [0, 0, 1, 1], [], []>} : vector<8x32xbf16>, vector<32x64xbf16>, vector<8x64xf32> -> vector<8x64xf32>
    %cst_14 = arith.constant dense<0.000000e+00> : vector<64xf32>
    %38 = vector.multi_reduction <add>, %37, %cst_14 [0] : vector<8x64xf32> to vector<64xf32>
    %39 = vector.shape_cast %38 : vector<64xf32> to vector<1x64xf32>
    %cst_15 = arith.constant 1.250000e-01 : f32
    %40 = vector.broadcast %cst_15 : f32 to vector<1x64xf32>
    %41 = arith.mulf %39, %40 : vector<1x64xf32>
    %42 = arith.mulf %37, %37 : vector<8x64xf32>
    %cst_16 = arith.constant dense<0.000000e+00> : vector<64xf32>
    %43 = vector.multi_reduction <add>, %42, %cst_16 [0] : vector<8x64xf32> to vector<64xf32>
    %44 = vector.shape_cast %43 : vector<64xf32> to vector<1x64xf32>
    %cst_17 = arith.constant 1.250000e-01 : f32
    %45 = vector.broadcast %cst_17 : f32 to vector<1x64xf32>
    %46 = arith.mulf %44, %45 : vector<1x64xf32>
    %47 = arith.mulf %41, %41 : vector<1x64xf32>
    %48 = arith.subf %46, %47 : vector<1x64xf32>
    %cst_18 = arith.constant 0.000000e+00 : f32
    %49 = vector.broadcast %cst_18 : f32 to vector<1x64xf32>
    %50 = arith.maximumf %48, %49 : vector<1x64xf32>
    %51 = vector.broadcast %41 : vector<1x64xf32> to vector<8x64xf32>
    %52 = arith.subf %37, %51 : vector<8x64xf32>
    %cst_19 = arith.constant 8.000000e-01 : f32
    %53 = vector.broadcast %cst_19 : f32 to vector<1x64xf32>
    %54 = arith.addf %50, %53 : vector<1x64xf32>
    %55 = math.rsqrt %54 : vector<1x64xf32>
    %56 = vector.broadcast %55 : vector<1x64xf32> to vector<8x64xf32>
    %57 = arith.mulf %52, %56 : vector<8x64xf32>
    %cst_20 = arith.constant 0.000000e+00 : f32
    %58 = vector.broadcast %cst_20 : f32 to vector<8x64xf32>
    %59 = arith.cmpf ogt, %57, %58 : vector<8x64xf32>
    %cst_21 = arith.constant 2.000000e-01 : f32
    %60 = vector.broadcast %cst_21 : f32 to vector<8x64xf32>
    %61 = arith.mulf %60, %57 : vector<8x64xf32>
    %62 = arith.select %59, %57, %61 : vector<8x64xi1>, vector<8x64xf32>
    %c0_i32_22 = arith.constant 0 : i32
    %63 = tpu.memref_slice %arg12[%c0_i32_22] : memref<3x!tpu.dma_semaphore, #tpu.memory_space<semaphore_mem>> -> memref<1x!tpu.dma_semaphore, #tpu.memory_space<semaphore_mem>>
    %64 = tpu.memref_squeeze %63 : memref<1x!tpu.dma_semaphore, #tpu.memory_space<semaphore_mem>> -> memref<!tpu.dma_semaphore, #tpu.memory_space<semaphore_mem>>
    tpu.wait_dma2 semaphore(%64 : memref<!tpu.dma_semaphore, #tpu.memory_space<semaphore_mem>>) src(%arg5 : memref<64x4096xbf16, #tpu.memory_space<any>>) dst(%arg9 : memref<64x4096xbf16, #tpu.memory_space<vmem>>)
    %65 = arith.truncf %62 : vector<8x64xf32> to vector<8x64xbf16>
    %c0_23 = arith.constant 0 : index
    %c0_24 = arith.constant 0 : index
    %66 = vector.load %arg9[%c0_23, %c0_24] : memref<64x4096xbf16, #tpu.memory_space<vmem>>, vector<64x4096xbf16>
    %cst_25 = arith.constant dense<0.000000e+00> : vector<8x4096xf32>
    %67 = tpu.matmul %65, %66, %cst_25 {dimension_numbers = #tpu.dot_dimension_numbers<[1], [0], [0], [1], [0, 0, 1, 1], [], []>} : vector<8x64xbf16>, vector<64x4096xbf16>, vector<8x4096xf32> -> vector<8x4096xf32>
    %c0_26 = arith.constant 0 : index
    %c0_27 = arith.constant 0 : index
    %68 = vector.load %arg3[%c0_26, %c0_27] : memref<1x4096xf32, #tpu.memory_space<vmem>>, vector<1x4096xf32>
    %69 = vector.broadcast %68 : vector<1x4096xf32> to vector<8x4096xf32>
    %70 = arith.addf %67, %69 : vector<8x4096xf32>
    %cst_28 = arith.constant 0.000000e+00 : f32
    %71 = vector.broadcast %cst_28 : f32 to vector<8x4096xf32>
    %72 = arith.cmpf ogt, %70, %71 : vector<8x4096xf32>
    %cst_29 = arith.constant 2.000000e-01 : f32
    %73 = vector.broadcast %cst_29 : f32 to vector<8x4096xf32>
    %74 = arith.mulf %73, %70 : vector<8x4096xf32>
    %75 = arith.select %72, %70, %74 : vector<8x4096xi1>, vector<8x4096xf32>
    %76 = arith.truncf %75 : vector<8x4096xf32> to vector<8x4096xbf16>
    %c1_i32_30 = arith.constant 1 : i32
    %77 = tpu.memref_slice %arg12[%c1_i32_30] : memref<3x!tpu.dma_semaphore, #tpu.memory_space<semaphore_mem>> -> memref<1x!tpu.dma_semaphore, #tpu.memory_space<semaphore_mem>>
    %78 = tpu.memref_squeeze %77 : memref<1x!tpu.dma_semaphore, #tpu.memory_space<semaphore_mem>> -> memref<!tpu.dma_semaphore, #tpu.memory_space<semaphore_mem>>
    tpu.wait_dma2 semaphore(%78 : memref<!tpu.dma_semaphore, #tpu.memory_space<semaphore_mem>>) src(%arg6 : memref<2048x128xbf16, #tpu.memory_space<any>>) dst(%arg10 : memref<2048x128xbf16, #tpu.memory_space<vmem>>)
    %79 = vector.extract_strided_slice %76 {offsets = [0, 0], sizes = [8, 2048], strides = [1, 1]} : vector<8x4096xbf16> to vector<8x2048xbf16>
    %c0_31 = arith.constant 0 : index
    %c0_32 = arith.constant 0 : index
    %80 = vector.load %arg10[%c0_31, %c0_32] : memref<2048x128xbf16, #tpu.memory_space<vmem>>, vector<2048x128xbf16>
    %cst_33 = arith.constant dense<0.000000e+00> : vector<8x128xf32>
    %81 = tpu.matmul %79, %80, %cst_33 {dimension_numbers = #tpu.dot_dimension_numbers<[1], [0], [0], [1], [0, 0, 1, 1], [], []>} : vector<8x2048xbf16>, vector<2048x128xbf16>, vector<8x128xf32> -> vector<8x128xf32>
    %c0_34 = arith.constant 0 : index
    %c0_35 = arith.constant 0 : index
    %82 = vector.load %arg4[%c0_34, %c0_35] : memref<1x384xf32, #tpu.memory_space<vmem>>, vector<1x128xf32>
    %83 = vector.broadcast %82 : vector<1x128xf32> to vector<8x128xf32>
    %84 = arith.addf %81, %83 : vector<8x128xf32>
    %c0_36 = arith.constant 0 : index
    %c0_37 = arith.constant 0 : index
    %85 = vector.load %arg8[%c0_36, %c0_37] : memref<8x384xf32, #tpu.memory_space<vmem>>, vector<8x128xf32>
    tpu.vector_store %arg8[%c0_36, %c0_37], %84 {strides = array<i32>} : memref<8x384xf32, #tpu.memory_space<vmem>>, vector<8x128xf32>,
    %c2_i32_38 = arith.constant 2 : i32
    %86 = tpu.memref_slice %arg12[%c2_i32_38] : memref<3x!tpu.dma_semaphore, #tpu.memory_space<semaphore_mem>> -> memref<1x!tpu.dma_semaphore, #tpu.memory_space<semaphore_mem>>
    %87 = tpu.memref_squeeze %86 : memref<1x!tpu.dma_semaphore, #tpu.memory_space<semaphore_mem>> -> memref<!tpu.dma_semaphore, #tpu.memory_space<semaphore_mem>>
    tpu.wait_dma2 semaphore(%87 : memref<!tpu.dma_semaphore, #tpu.memory_space<semaphore_mem>>) src(%arg7 : memref<2048x256xbf16, #tpu.memory_space<any>>) dst(%arg11 : memref<2048x256xbf16, #tpu.memory_space<vmem>>)
    %88 = vector.extract_strided_slice %76 {offsets = [0, 2048], sizes = [8, 2048], strides = [1, 1]} : vector<8x4096xbf16> to vector<8x2048xbf16>
    %c0_39 = arith.constant 0 : index
    %c0_40 = arith.constant 0 : index
    %89 = vector.load %arg11[%c0_39, %c0_40] : memref<2048x256xbf16, #tpu.memory_space<vmem>>, vector<2048x256xbf16>
    %cst_41 = arith.constant dense<0.000000e+00> : vector<8x256xf32>
    %90 = tpu.matmul %88, %89, %cst_41 {dimension_numbers = #tpu.dot_dimension_numbers<[1], [0], [0], [1], [0, 0, 1, 1], [], []>} : vector<8x2048xbf16>, vector<2048x256xbf16>, vector<8x256xf32> -> vector<8x256xf32>
    %c0_42 = arith.constant 0 : index
    %c128 = arith.constant 128 : index
    %91 = vector.load %arg4[%c0_42, %c128] : memref<1x384xf32, #tpu.memory_space<vmem>>, vector<1x256xf32>
    %92 = vector.broadcast %91 : vector<1x256xf32> to vector<8x256xf32>
    %93 = arith.addf %90, %92 : vector<8x256xf32>
    %c0_43 = arith.constant 0 : index
    %c128_44 = arith.constant 128 : index
    %94 = vector.load %arg8[%c0_43, %c128_44] : memref<8x384xf32, #tpu.memory_space<vmem>>, vector<8x256xf32>
    tpu.vector_store %arg8[%c0_43, %c128_44], %93 {strides = array<i32>} : memref<8x384xf32, #tpu.memory_space<vmem>>, vector<8x256xf32>,
    return
  }
}

</mosaic_0001>

<bundles_post_ra>
// kernel: generator_forward.1
= control target key start
LH: loop header
LB: loop body
LE: loop exit
PB: predicated region body
PF: predicated region fallthrough
CT: control target
= control target key end

     0   :  { %13 = vsyncpa [#allocation7], 0  ;;  %s3300_s0 = inlined_call_operand.vmem [shape: f32[8,16], index: 0, kind: input, shape index: {}]   ;;  %s3301_s1 = inlined_call_operand.vmem [shape: bf16[16,32], index: 1, kind: input, shape index: {}]   ;;  %s3302_s2 = inlined_call_operand.vmem [shape: bf16[32,64], index: 2, kind: input, shape index: {}]   ;;  %s3303_s3 = inlined_call_operand.hbm [shape: f32[1,4096], index: 3, kind: input, shape index: {}]   ;;  %s3304_s4 = inlined_call_operand.hbm [shape: f32[1,384], index: 4, kind: input, shape index: {}]   ;;  %s3305_s5 = inlined_call_operand.hbm [shape: bf16[64,4096], index: 5, kind: input, shape index: {}]   ;;  %s3306_s6 = inlined_call_operand.hbm [shape: bf16[2048,128], index: 6, kind: input, shape index: {}]   ;;  %s3307_s7 = inlined_call_operand.hbm [shape: bf16[2048,256], index: 7, kind: input, shape index: {}]   ;;  %s3308_s8 = inlined_call_operand.vmem [shape: f32[8,384], index: 8, kind: output, shape index: {}]  }
   0x1   :  { %14 = vsyncpa [#allocation9], 0  ;;  %s2830_s27 = smov [#allocation6]   ;;  %s2831_s29 = smov [#allocation8]  }
   0x2   :  { %s27_s28 = sshll.u32 %s2830_s27, 4  ;;  %s37_s30 = sshll.u32 %s2831_s29, 4  ;;  %s28_s28 = int_to_ptr.vmem [resolvable:$true] %s27_s28  ;;  %s38_s30 = int_to_ptr.vmem [resolvable:$true] %s37_s30 }
   0x3   :  { %s2754_s11 = scalar_lea.hbm %s3303_s3, 512 }
   0x4   :  { %p2755_p0 = scmp.ne.s32.totalorder %s3303_s3, %s2754_s11  ;;  %p2758_p1 = scmp.lt.u32.totalorder %s2754_s11, %s3303_s3 }
   0x6   :  { %p2760_p2 = pnand %p2758_p1, %p2755_p0 }
   0x8   :  { %2763 = shalt.err (!%p2760_p2)
}
   0x9   :  { %s2764_s16 = scalar_lea.vmem %s28_s28, 512  ;;  %p2769_p4 = scmp.lt.s32.totalorder %s28_s28, %s28_s28 }
   0xa   :  { %p2765_p3 = scmp.ne.s32.totalorder %s28_s28, %s2764_s16  ;;  %p2770_p5 = scmp.lt.s32.totalorder %s2764_s16, %s2764_s16 }
   0xc   :  { %p2771_p6 = por %p2770_p5, %p2769_p4 }
   0xe   :  { %p2772_p7 = pnand %p2771_p6, %p2765_p3 }
  0x10   :  { %2775 = shalt.err (!%p2772_p7)
}
  0x11   :  { %30 = dma.hbm_to_vmem [thread:$0]  %s3303_s3, 512, %s28_s28, [#allocation7]  }
  0x12   :  { %s2776_s21 = scalar_lea.hbm %s3304_s4, 48 }
  0x13   :  { %p2777_p8 = scmp.ne.s32.totalorder %s3304_s4, %s2776_s21  ;;  %p2780_p9 = scmp.lt.u32.totalorder %s2776_s21, %s3304_s4 }
  0x15   :  { %p2782_p10 = pnand %p2780_p9, %p2777_p8 }
  0x17   :  { %2785 = shalt.err (!%p2782_p10)
}
  0x18   :  { %s2786_s26 = scalar_lea.vmem %s38_s30, 48  ;;  %s2790_s27 = scalar_lea.vmem %s38_s30, 64 }
  0x19   :  { %p2787_p11 = scmp.ne.s32.totalorder %s38_s30, %s2786_s26  ;;  %p2791_p12 = scmp.lt.s32.totalorder %s38_s30, %s38_s30 }
  0x1a   :  { %p2792_p13 = scmp.lt.s32.totalorder %s2790_s27, %s2786_s26 }
  0x1c   :  { %p2793_p0 = por %p2792_p13, %p2791_p12 }
  0x1e   :  { %p2794_p1 = pnand %p2793_p0, %p2787_p11 }
  0x20   :  { %2797 = shalt.err (!%p2794_p1)
}
  0x21   :  { %40 = dma.hbm_to_vmem [thread:$0]  %s3304_s4, 48, %s38_s30, [#allocation9]  }
  0x22   :  { %2820 = dma.done.wait [#allocation7], 512  }
  0x23   :  { %2821 = vsyncadd [#allocation7], 4294966784 }
  0x24   :  { %2822 = dma.done.wait [#allocation9], 48  }
  0x25   :  { %2823 = vsyncadd [#allocation9], 4294967248  ;;  %s52_s29 = sld [smem:[#allocation0]]   ;;  %s2832_s9 = smov 4096   ;;  %v2833_v0 = vmov 0.0   ;;  %vm2834_vm0 = vmmov 0  }
  0x26   :  { %64 = sst [smem:[#allocation11]] %s2832_s9  ;;  %2685 = vmatprep.subr.bf16.mxu0 %v2833_v0  ;;  %2687 = vmatprep.mubr.msk.bf16.mxu0 %vm2834_vm0, %v2833_v0  ;;  %s2835_s10 = smov 32  }
  0x27   :  { %66 = sst [smem:[#allocation11 + $0x1]] %s2832_s9  ;;  %2691 = vmatprep.subr.bf16.mxu1 %v2833_v0  ;;  %2695 = vmatprep.mubr.msk.bf16.mxu1 %vm2834_vm0, %v2833_v0  ;;  %s2836_s4 = smov 64  }
  0x28   :  { %68 = sst [smem:[#allocation11 + $0x2]] %s2835_s10  ;;  %s2837_s30 = smov 128  }
  0x29   :  { %70 = sst [smem:[#allocation11 + $0x3]] %s2836_s4  ;;  %s2838_s11 = smov 2  }
  0x2a   :  { %72 = sst [smem:[#allocation11 + $0x4]] %s2837_s30  ;;  %s2839_s13 = smov 2048  }
  0x2b   :  { %74 = sst [smem:[#allocation11 + $0x5]] %s2838_s11  ;;  %s2475_s12 = sshll.u32 %s52_s29, 26 }
  0x2c   :  { %76 = sst [smem:[#allocation11 + $0x6]] %s2839_s13  ;;  %s2924_s14 = sadd.s32 134217728, %s2475_s12 }
  0x2d   :  { %78 = sst [smem:[#allocation11 + $0x7]] %s2836_s4  ;;  %s2840_s15 = smov 4  }
  0x2e   :  { %80 = sst [smem:[#allocation11 + $0x8]] %s2840_s15  ;;  %s2841_s16 = smov [#allocation2]  }
  0x2f   :  { %s60_s17 = sshll.u32 %s2841_s16, 4  ;;  %s2842_s18 = smov [#allocation5]   ;;  %s61_s17 = int_to_ptr.vmem [resolvable:$true] %s60_s17 }
  0x30   :  { %s2843_s19 = smov [#allocation10]   ;;  %s2844_s22 = smov 256  }
  0x31   :  { %82 = dma.general %s3305_s5, 16384, %s61_s17, %s2842_s18, %s2843_s19, [#allocation11], %s2924_s14, 0  }
  0x32   :  { %115 = sst [smem:[#allocation17 + $0x2]] %s2838_s11  ;;  %s2845_s23 = smov [#allocation3]  }
  0x33   :  { %111 = sst [smem:[#allocation17]] %s2844_s22  ;;  %s91_s24 = sshll.u32 %s2845_s23, 4  ;;  %s92_s24 = int_to_ptr.vmem [resolvable:$true] %s91_s24 }
  0x34   :  { %113 = sst [smem:[#allocation17 + $0x1]] %s2844_s22  ;;  %s2846_s25 = smov [#allocation4]  }
  0x35   :  { %117 = sst [smem:[#allocation17 + $0x3]] %s2836_s4  ;;  %s107_s26 = sshll.u32 %s2846_s25, 4  ;;  %s108_s26 = int_to_ptr.vmem [resolvable:$true] %s107_s26 }
  0x36   :  { %119 = sst [smem:[#allocation17 + $0x4]] %s2837_s30  ;;  %s2798_s3 = scalar_lea.hbm %s3306_s6, 16384 }
  0x37   :  { %121 = sst [smem:[#allocation17 + $0x5]] %s2838_s11  ;;  %p2799_p2 = scmp.ne.s32.totalorder %s3306_s6, %s2798_s3 }
  0x38   :  { %123 = sst [smem:[#allocation17 + $0x6]] %s2837_s30  ;;  %p2802_p3 = scmp.lt.u32.totalorder %s2798_s3, %s3306_s6 }
  0x39   :  { %125 = sst [smem:[#allocation17 + $0x7]] %s2836_s4 }
  0x3a   :  { %127 = sst [smem:[#allocation17 + $0x8]] %s2840_s15  ;;  %p2804_p4 = pnand %p2802_p3, %p2799_p2 }
  0x3c   :  { %2807 = shalt.err (!%p2804_p4)  }
  0x3d   :  { %s2808_s11 = scalar_lea.vmem %s92_s24, 16384  ;;  %p2813_p6 = scmp.lt.s32.totalorder %s92_s24, %s92_s24 }
  0x3e   :  { %p2809_p5 = scmp.ne.s32.totalorder %s92_s24, %s2808_s11  ;;  %p2814_p7 = scmp.lt.s32.totalorder %s2808_s11, %s2808_s11 }
  0x40   :  { %p2815_p8 = por %p2814_p7, %p2813_p6 }
  0x42   :  { %p2816_p9 = pnand %p2815_p8, %p2809_p5 }
  0x44   :  { %2819 = shalt.err (!%p2816_p9)  }
  0x45   :  { %94 = dma.hbm_to_vmem [thread:$0]  %s3306_s6, 16384, %s92_s24, [#allocation5 + $0x1]  ;;  %vm140_vm1 = vcmask 130048   ;;  %vm184_vm2 = vcmask 261120   ;;  %vm272_vm4 = vcmask 523264  }
  0x46   :  { %s2847_s12 = smov [#allocation5 + $0x2]   ;;  %s2848_s13 = smov [#allocation16]  }
  0x47   :  { %129 = dma.general %s3307_s7, 32768, %s108_s26, %s2847_s12, %s2848_s13, [#allocation17], %s2924_s14, 0  }
  0x48   :  { %v2747_v1 = vld [vmem:[%s3301_s1] sm:$0xff]   ;;  %v2749_v5 = vld [vmem:[%s3302_s2 + $0x8] sm:$0xff]  }
  0x49   :  { %v130_v2 = vld [vmem:[%s3300_s0] sm:$0xff]  ;;  %2686 = vmatpush3.bf16.msra.mxu0 %v2747_v1 }
  0x4a   :  { %v131_v3 = vpack.c.bf16 %v130_v2, %v130_v2  ;;  %v2748_v4 = vld [vmem:[%s3302_s2] sm:$0xff]  }
  0x4b   :  { %2692 = vmatpush3.bf16.msra.mxu1 %v2748_v4 }
  0x4c   :  { %2688 = vmatmul.mubr.msk.bf16.vlgmr.msra.gmra.mrb[0].mxu0 %vm140_vm1, %v131_v3  ;;  %2693 = vmatprep.subr.bf16.mxu1 %v2833_v0 }
  0x4f   :  { %2694 = vmatpush3.bf16.msra.mxu1 %v2749_v5 }
 0x11f   :  { %v178_v6 = vpop.f32.mrb[0].mxu0 }
 0x120   :  { %v185_v7 = vsel %vm184_vm2, %v178_v6, 0.0  ;;  %v193_v8 = vmul.f32 %v178_v6, %v178_v6  ;;  %v2689_v9 = vpop.f32.mrb[1].mxu0 }
 0x121   :  { %v186_v10 = vrot.slane %v185_v7, 4  ;;  %v181_v11 = vpop.f32.mrb[2].mxu0 }
 0x122   :  { %v194_v12 = vsel %vm184_vm2, %v193_v8, 0.0  ;;  %v2690_v13 = vpop.f32.mrb[3].mxu0 }
 0x123   :  { %v187_v14 = vadd.f32 %v186_v10, %v185_v7  ;;  %v195_v15 = vrot.slane %v194_v12, 4 }
 0x125   :  { %v188_v16 = vrot.slane %v187_v14, 2  ;;  %v196_v17 = vadd.f32 %v195_v15, %v194_v12 }
 0x127   :  { %v189_v18 = vadd.f32 %v188_v16, %v187_v14  ;;  %v197_v19 = vrot.slane %v196_v17, 2 }
 0x129   :  { %v190_v20 = vrot.slane %v189_v18, 1  ;;  %v198_v21 = vadd.f32 %v197_v19, %v196_v17 }
 0x12b   :  { %v191_v22 = vadd.f32 %v190_v20, %v189_v18  ;;  %v199_v23 = vrot.slane %v198_v21, 1 }
 0x12d   :  { %v192_v24 = vmul.f32 0.125, %v191_v22  ;;  %v200_v25 = vadd.f32 %v199_v23, %v198_v21 }
 0x12f   :  { %v201_v26 = vmul.f32 0.125, %v200_v25  ;;  %v202_v27 = vmul.f32 %v192_v24, %v192_v24  ;;  %v205_v31 = vsub.f32 %v178_v6, %v192_v24 }
 0x131   :  { %v203_v28 = vsub.f32 %v201_v26, %v202_v27 }
 0x133   :  { %v204_v29 = vmax.f32 %v203_v28, 0.0 }
 0x135   :  { %v206_v30 = vadd.f32 0.8, %v204_v29 }
 0x137   :  { %2750 = vrsqrt.f32 %v206_v30 }
 0x141   :  { %v2751_v32 = vpop.eup %2750 }
 0x142   :  { %v208_v33 = vmul.f32 %v2751_v32, %v205_v31 }
 0x144   :  { %v210_v34 = vmul.f32 0.2, %v208_v33  ;;  %vm209_vm3 = vcmp.gt.f32.partialorder %v208_v33, 0.0 }
 0x146   :  { %v211_v35 = vsel %vm209_vm3, %v208_v33, %v210_v34 }
 0x147   :  { %v212_v36 = vpack.c.bf16 %v211_v35, %v211_v35 }
 0x149   :  { %2696 = vmatmul.mubr.msk.bf16.vlgmr.msra.gmra.mrb[0].mxu1 %vm184_vm2, %v212_v36 }
 0x21c   :  { %v266_v37 = vpop.f32.mrb[0].mxu1 }
 0x21d   :  { %v273_v38 = vsel %vm272_vm4, %v266_v37, 0.0  ;;  %v281_v39 = vmul.f32 %v266_v37, %v266_v37  ;;  %v2697_v40 = vpop.f32.mrb[1].mxu1 }
 0x21e   :  { %v274_v41 = vrot.slane %v273_v38, 4  ;;  %v269_v42 = vpop.f32.mrb[2].mxu1 }
 0x21f   :  { %v282_v43 = vsel %vm272_vm4, %v281_v39, 0.0  ;;  %v2698_v44 = vpop.f32.mrb[3].mxu1 }
 0x220   :  { %v275_v45 = vadd.f32 %v274_v41, %v273_v38  ;;  %v283_v46 = vrot.slane %v282_v43, 4 }
 0x222   :  { %v276_v47 = vrot.slane %v275_v45, 2  ;;  %v284_v48 = vadd.f32 %v283_v46, %v282_v43 }
 0x224   :  { %v277_v49 = vadd.f32 %v276_v47, %v275_v45  ;;  %v285_v50 = vrot.slane %v284_v48, 2 }
 0x226   :  { %v278_v51 = vrot.slane %v277_v49, 1  ;;  %v286_v52 = vadd.f32 %v285_v50, %v284_v48 }
 0x228   :  { %v279_v53 = vadd.f32 %v278_v51, %v277_v49  ;;  %v287_v54 = vrot.slane %v286_v52, 1 }
 0x22a   :  { %v280_v55 = vmul.f32 0.125, %v279_v53  ;;  %v288_v56 = vadd.f32 %v287_v54, %v286_v52 }
 0x22c   :  { %v289_v57 = vmul.f32 0.125, %v288_v56  ;;  %v290_v58 = vmul.f32 %v280_v55, %v280_v55  ;;  %v293_v62 = vsub.f32 %v266_v37, %v280_v55 }
 0x22e   :  { %v291_v59 = vsub.f32 %v289_v57, %v290_v58 }
 0x230   :  { %v292_v60 = vmax.f32 %v291_v59, 0.0 }
 0x232   :  { %v294_v61 = vadd.f32 0.8, %v292_v60 }
 0x234   :  { %2752 = vrsqrt.f32 %v294_v61 }
 0x23e   :  { %v2753_v63 = vpop.eup %2752 }
 0x23f   :  { %v296_v0 = vmul.f32 %v2753_v63, %v293_v62 }
 0x241   :  { %vm297_vm5 = vcmp.gt.f32.partialorder %v296_v0, 0.0  ;;  %v298_v1 = vmul.f32 0.2, %v296_v0 }
 0x243   :  { %v299_v2 = vsel %vm297_vm5, %v296_v0, %v298_v1 }
 0x244   :  { %2824 = dma.done.wait [#allocation5], 16384 }
 0x245   :  { %2825 = vsyncadd [#allocation5], 4294950912  ;;  %v2849_v3 = vmov 0   ;;  %v306_v4 = vld [vmem:[#allocation2 + $0x8] sm:$0xff]  ;;  %v308_v5 = vld [vmem:[#allocation2 + $0x18] sm:$0xff]  ;;  %v2969_v22 = vpack.c.bf16 %v299_v2, %v299_v2 }
 0x246   :  { %636 = vmatprep.mubr.bf16.mxu0 %v2849_v3  ;;  %677 = vmatprep.mubr.bf16.mxu1 %v2849_v3  ;;  %v305_v6 = vld [vmem:[#allocation2] sm:$0xff]  ;;  %v307_v7 = vld [vmem:[#allocation2 + $0x10] sm:$0xff]  ;;  %v338_v8 = vld [vmem:[#allocation2 + $0x108] sm:$0xff] }
 0x247   :  { %604 = vmatprep.subr.bf16.mxu0 %v306_v4  ;;  %645 = vmatprep.subr.bf16.mxu1 %v308_v5  ;;  %v340_v9 = vld [vmem:[#allocation2 + $0x118] sm:$0xff]  ;;  %v337_v10 = vld [vmem:[#allocation2 + $0x100] sm:$0xff]  ;;  %v339_v11 = vld [vmem:[#allocation2 + $0x110] sm:$0xff] }
 0x248   :  { %605 = vmatpush1.bf16.msra.mxu0 %v305_v6  ;;  %646 = vmatpush1.bf16.msra.mxu1 %v307_v7  ;;  %v370_v12 = vld [vmem:[#allocation2 + $0x208] sm:$0xff]  ;;  %v372_v13 = vld [vmem:[#allocation2 + $0x218] sm:$0xff]  ;;  %v369_v14 = vld [vmem:[#allocation2 + $0x200] sm:$0xff] }
 0x249   :  { %606 = vmatprep.subr.bf16.mxu0 %v338_v8  ;;  %647 = vmatprep.subr.bf16.mxu1 %v340_v9  ;;  %v371_v15 = vld [vmem:[#allocation2 + $0x210] sm:$0xff]  ;;  %v402_v16 = vld [vmem:[#allocation2 + $0x308] sm:$0xff]  ;;  %v404_v17 = vld [vmem:[#allocation2 + $0x318] sm:$0xff] }
 0x24a   :  { %v401_v18 = vld [vmem:[#allocation2 + $0x300] sm:$0xff]  ;;  %v403_v19 = vld [vmem:[#allocation2 + $0x310] sm:$0xff]  ;;  %v310_v20 = vld [vmem:[#allocation2 + $0x28] sm:$0xff] }
 0x24b   :  { %v312_v21 = vld [vmem:[#allocation2 + $0x38] sm:$0xff]  ;;  %v309_v23 = vld [vmem:[#allocation2 + $0x20] sm:$0xff]  ;;  %v311_v24 = vld [vmem:[#allocation2 + $0x30] sm:$0xff] }
 0x24c   :  { %607 = vmatpush1.bf16.msra.mxu0 %v337_v10  ;;  %648 = vmatpush1.bf16.msra.mxu1 %v339_v11  ;;  %v342_v25 = vld [vmem:[#allocation2 + $0x128] sm:$0xff]  ;;  %v344_v26 = vld [vmem:[#allocation2 + $0x138] sm:$0xff]  ;;  %v341_v27 = vld [vmem:[#allocation2 + $0x120] sm:$0xff] }
 0x24d   :  { %608 = vmatprep.subr.bf16.mxu0 %v370_v12  ;;  %649 = vmatprep.subr.bf16.mxu1 %v372_v13  ;;  %v343_v28 = vld [vmem:[#allocation2 + $0x130] sm:$0xff]  ;;  %v374_v29 = vld [vmem:[#allocation2 + $0x228] sm:$0xff]  ;;  %v376_v30 = vld [vmem:[#allocation2 + $0x238] sm:$0xff] }
 0x24e   :  { %v373_v31 = vld [vmem:[#allocation2 + $0x220] sm:$0xff]  ;;  %v375_v32 = vld [vmem:[#allocation2 + $0x230] sm:$0xff]  ;;  %v406_v33 = vld [vmem:[#allocation2 + $0x328] sm:$0xff] }
 0x24f   :  { %v408_v34 = vld [vmem:[#allocation2 + $0x338] sm:$0xff]  ;;  %v405_v35 = vld [vmem:[#allocation2 + $0x320] sm:$0xff]  ;;  %v407_v36 = vld [vmem:[#allocation2 + $0x330] sm:$0xff] }
 0x250   :  { %609 = vmatpush1.bf16.msra.mxu0 %v369_v14  ;;  %650 = vmatpush1.bf16.msra.mxu1 %v371_v15  ;;  %v314_v37 = vld [vmem:[#allocation2 + $0x48] sm:$0xff]  ;;  %v316_v38 = vld [vmem:[#allocation2 + $0x58] sm:$0xff]  ;;  %v313_v39 = vld [vmem:[#allocation2 + $0x40] sm:$0xff] }
 0x251   :  { %610 = vmatprep.subr.bf16.mxu0 %v402_v16  ;;  %651 = vmatprep.subr.bf16.mxu1 %v404_v17  ;;  %v315_v40 = vld [vmem:[#allocation2 + $0x50] sm:$0xff]  ;;  %v346_v41 = vld [vmem:[#allocation2 + $0x148] sm:$0xff]  ;;  %v348_v42 = vld [vmem:[#allocation2 + $0x158] sm:$0xff] }
 0x252   :  { %v345_v43 = vld [vmem:[#allocation2 + $0x140] sm:$0xff]  ;;  %v347_v44 = vld [vmem:[#allocation2 + $0x150] sm:$0xff]  ;;  %v378_v45 = vld [vmem:[#allocation2 + $0x248] sm:$0xff] }
 0x253   :  { %v380_v46 = vld [vmem:[#allocation2 + $0x258] sm:$0xff]  ;;  %v377_v47 = vld [vmem:[#allocation2 + $0x240] sm:$0xff]  ;;  %v379_v48 = vld [vmem:[#allocation2 + $0x250] sm:$0xff] }
 0x254   :  { %611 = vmatpush1.bf16.msra.mxu0 %v401_v18  ;;  %652 = vmatpush1.bf16.msra.mxu1 %v403_v19  ;;  %v410_v49 = vld [vmem:[#allocation2 + $0x348] sm:$0xff]  ;;  %v412_v50 = vld [vmem:[#allocation2 + $0x358] sm:$0xff]  ;;  %v409_v51 = vld [vmem:[#allocation2 + $0x340] sm:$0xff] }
 0x255   :  { %686 = vmatprep.subr.bf16.mxu0 %v310_v20  ;;  %727 = vmatprep.subr.bf16.mxu1 %v312_v21  ;;  %v411_v52 = vld [vmem:[#allocation2 + $0x350] sm:$0xff]  ;;  %v318_v53 = vld [vmem:[#allocation2 + $0x68] sm:$0xff]  ;;  %v320_v54 = vld [vmem:[#allocation2 + $0x78] sm:$0xff] }
 0x256   :  { %v317_v55 = vld [vmem:[#allocation2 + $0x60] sm:$0xff]  ;;  %v319_v56 = vld [vmem:[#allocation2 + $0x70] sm:$0xff]  ;;  %v350_v57 = vld [vmem:[#allocation2 + $0x168] sm:$0xff] }
 0x257   :  { %2484 = vmatmul.mubr.msk.bf16.vlgmr.msra.gmra.mrb[4].mxu0 %vm272_vm4, %v2969_v22  ;;  %2485 = vmatmul.mubr.msk.bf16.vlgmr.msra.gmra.mrb[4].mxu1 %vm272_vm4, %v2969_v22  ;;  %v352_v58 = vld [vmem:[#allocation2 + $0x178] sm:$0xff]  ;;  %v349_v59 = vld [vmem:[#allocation2 + $0x160] sm:$0xff]  ;;  %v351_v60 = vld [vmem:[#allocation2 + $0x170] sm:$0xff] }
 0x258   :  { %687 = vmatpush1.bf16.msra.mxu0 %v309_v23  ;;  %728 = vmatpush1.bf16.msra.mxu1 %v311_v24  ;;  %v382_v61 = vld [vmem:[#allocation2 + $0x268] sm:$0xff]  ;;  %v384_v62 = vld [vmem:[#allocation2 + $0x278] sm:$0xff]  ;;  %v381_v63 = vld [vmem:[#allocation2 + $0x260] sm:$0xff] }
 0x259   :  { %688 = vmatprep.subr.bf16.mxu0 %v342_v25  ;;  %729 = vmatprep.subr.bf16.mxu1 %v344_v26  ;;  %v383_v0 = vld [vmem:[#allocation2 + $0x270] sm:$0xff]  ;;  %v414_v1 = vld [vmem:[#allocation2 + $0x368] sm:$0xff]  ;;  %v416_v2 = vld [vmem:[#allocation2 + $0x378] sm:$0xff] }
 0x25a   :  { %718 = vmatprep.mubr.bf16.mxu0 %v2849_v3  ;;  %759 = vmatprep.mubr.bf16.mxu1 %v2849_v3  ;;  %v413_v4 = vld [vmem:[#allocation2 + $0x360] sm:$0xff]  ;;  %v415_v5 = vld [vmem:[#allocation2 + $0x370] sm:$0xff]  ;;  %v322_v6 = vld [vmem:[#allocation2 + $0x88] sm:$0xff] }
 0x25b   :  { %v324_v7 = vld [vmem:[#allocation2 + $0x98] sm:$0xff]  ;;  %v321_v8 = vld [vmem:[#allocation2 + $0x80] sm:$0xff]  ;;  %v323_v9 = vld [vmem:[#allocation2 + $0x90] sm:$0xff] }
 0x25c   :  { %689 = vmatpush1.bf16.msra.mxu0 %v341_v27  ;;  %730 = vmatpush1.bf16.msra.mxu1 %v343_v28  ;;  %v354_v10 = vld [vmem:[#allocation2 + $0x188] sm:$0xff]  ;;  %v356_v11 = vld [vmem:[#allocation2 + $0x198] sm:$0xff]  ;;  %v353_v12 = vld [vmem:[#allocation2 + $0x180] sm:$0xff] }
 0x25d   :  { %690 = vmatprep.subr.bf16.mxu0 %v374_v29  ;;  %731 = vmatprep.subr.bf16.mxu1 %v376_v30  ;;  %v355_v13 = vld [vmem:[#allocation2 + $0x190] sm:$0xff]  ;;  %v386_v14 = vld [vmem:[#allocation2 + $0x288] sm:$0xff]  ;;  %v388_v15 = vld [vmem:[#allocation2 + $0x298] sm:$0xff] }
 0x25e   :  { %v385_v16 = vld [vmem:[#allocation2 + $0x280] sm:$0xff]  ;;  %v387_v17 = vld [vmem:[#allocation2 + $0x290] sm:$0xff]  ;;  %v418_v18 = vld [vmem:[#allocation2 + $0x388] sm:$0xff] }
 0x25f   :  { %v420_v19 = vld [vmem:[#allocation2 + $0x398] sm:$0xff]  ;;  %v417_v20 = vld [vmem:[#allocation2 + $0x380] sm:$0xff]  ;;  %v419_v21 = vld [vmem:[#allocation2 + $0x390] sm:$0xff] }
 0x260   :  { %691 = vmatpush1.bf16.msra.mxu0 %v373_v31  ;;  %732 = vmatpush1.bf16.msra.mxu1 %v375_v32  ;;  %v326_v23 = vld [vmem:[#allocation2 + $0xa8] sm:$0xff]  ;;  %v328_v24 = vld [vmem:[#allocation2 + $0xb8] sm:$0xff]  ;;  %v325_v25 = vld [vmem:[#allocation2 + $0xa0] sm:$0xff] }
 0x261   :  { %692 = vmatprep.subr.bf16.mxu0 %v406_v33  ;;  %733 = vmatprep.subr.bf16.mxu1 %v408_v34  ;;  %v327_v26 = vld [vmem:[#allocation2 + $0xb0] sm:$0xff]  ;;  %v358_v27 = vld [vmem:[#allocation2 + $0x1a8] sm:$0xff]  ;;  %v360_v28 = vld [vmem:[#allocation2 + $0x1b8] sm:$0xff] }
 0x262   :  { %v357_v29 = vld [vmem:[#allocation2 + $0x1a0] sm:$0xff]  ;;  %v359_v30 = vld [vmem:[#allocation2 + $0x1b0] sm:$0xff]  ;;  %v390_v31 = vld [vmem:[#allocation2 + $0x2a8] sm:$0xff] }
 0x263   :  { %v392_v32 = vld [vmem:[#allocation2 + $0x2b8] sm:$0xff]  ;;  %v389_v33 = vld [vmem:[#allocation2 + $0x2a0] sm:$0xff]  ;;  %v391_v34 = vld [vmem:[#allocation2 + $0x2b0] sm:$0xff] }
 0x264   :  { %693 = vmatpush1.bf16.msra.mxu0 %v405_v35  ;;  %734 = vmatpush1.bf16.msra.mxu1 %v407_v36  ;;  %v422_v35 = vld [vmem:[#allocation2 + $0x3a8] sm:$0xff]  ;;  %v424_v36 = vld [vmem:[#allocation2 + $0x3b8] sm:$0xff] }
 0x265   :  { %768 = vmatprep.subr.bf16.mxu0 %v314_v37  ;;  %809 = vmatprep.subr.bf16.mxu1 %v316_v38  ;;  %v421_v37 = vld [vmem:[#allocation2 + $0x3a0] sm:$0xff]  ;;  %v423_v38 = vld [vmem:[#allocation2 + $0x3b0] sm:$0xff] }
 0x267   :  { %2486 = vmatmul.mubr.msk.bf16.vlgmr.msra.gmra.mrb[8].mxu0 %vm272_vm4, %v2969_v22  ;;  %2487 = vmatmul.mubr.msk.bf16.vlgmr.msra.gmra.mrb[8].mxu1 %vm272_vm4, %v2969_v22 }
 0x268   :  { %769 = vmatpush1.bf16.msra.mxu0 %v313_v39  ;;  %810 = vmatpush1.bf16.msra.mxu1 %v315_v40  ;;  %v330_v39 = vld [vmem:[#allocation2 + $0xc8] sm:$0xff]  ;;  %v332_v40 = vld [vmem:[#allocation2 + $0xd8] sm:$0xff] }
 0x269   :  { %770 = vmatprep.subr.bf16.mxu0 %v346_v41  ;;  %811 = vmatprep.subr.bf16.mxu1 %v348_v42  ;;  %v329_v41 = vld [vmem:[#allocation2 + $0xc0] sm:$0xff]  ;;  %v331_v42 = vld [vmem:[#allocation2 + $0xd0] sm:$0xff] }
 0x26a   :  { %800 = vmatprep.mubr.bf16.mxu0 %v2849_v3  ;;  %841 = vmatprep.mubr.bf16.mxu1 %v2849_v3 }
 0x26c   :  { %771 = vmatpush1.bf16.msra.mxu0 %v345_v43  ;;  %812 = vmatpush1.bf16.msra.mxu1 %v347_v44  ;;  %v362_v43 = vld [vmem:[#allocation2 + $0x1c8] sm:$0xff]  ;;  %v364_v44 = vld [vmem:[#allocation2 + $0x1d8] sm:$0xff] }
 0x26d   :  { %772 = vmatprep.subr.bf16.mxu0 %v378_v45  ;;  %813 = vmatprep.subr.bf16.mxu1 %v380_v46  ;;  %v361_v45 = vld [vmem:[#allocation2 + $0x1c0] sm:$0xff]  ;;  %v363_v46 = vld [vmem:[#allocation2 + $0x1d0] sm:$0xff] }
 0x270   :  { %773 = vmatpush1.bf16.msra.mxu0 %v377_v47  ;;  %814 = vmatpush1.bf16.msra.mxu1 %v379_v48  ;;  %v394_v47 = vld [vmem:[#allocation2 + $0x2c8] sm:$0xff]  ;;  %v396_v48 = vld [vmem:[#allocation2 + $0x2d8] sm:$0xff] }
 0x271   :  { %774 = vmatprep.subr.bf16.mxu0 %v410_v49  ;;  %815 = vmatprep.subr.bf16.mxu1 %v412_v50  ;;  %v393_v49 = vld [vmem:[#allocation2 + $0x2c0] sm:$0xff]  ;;  %v395_v50 = vld [vmem:[#allocation2 + $0x2d0] sm:$0xff] }
 0x274   :  { %775 = vmatpush1.bf16.msra.mxu0 %v409_v51  ;;  %816 = vmatpush1.bf16.msra.mxu1 %v411_v52  ;;  %v426_v51 = vld [vmem:[#allocation2 + $0x3c8] sm:$0xff]  ;;  %v428_v52 = vld [vmem:[#allocation2 + $0x3d8] sm:$0xff] }
 0x275   :  { %850 = vmatprep.subr.bf16.mxu0 %v318_v53  ;;  %891 = vmatprep.subr.bf16.mxu1 %v320_v54  ;;  %v425_v53 = vld [vmem:[#allocation2 + $0x3c0] sm:$0xff]  ;;  %v427_v54 = vld [vmem:[#allocation2 + $0x3d0] sm:$0xff] }
 0x277   :  { %2488 = vmatmul.mubr.msk.bf16.vlgmr.msra.gmra.mrb[12].mxu0 %vm272_vm4, %v2969_v22  ;;  %2489 = vmatmul.mubr.msk.bf16.vlgmr.msra.gmra.mrb[12].mxu1 %vm272_vm4, %v2969_v22 }
 0x278   :  { %851 = vmatpush1.bf16.msra.mxu0 %v317_v55  ;;  %892 = vmatpush1.bf16.msra.mxu1 %v319_v56  ;;  %v334_v55 = vld [vmem:[#allocation2 + $0xe8] sm:$0xff]  ;;  %v336_v56 = vld [vmem:[#allocation2 + $0xf8] sm:$0xff] }
 0x279   :  { %852 = vmatprep.subr.bf16.mxu0 %v350_v57  ;;  %893 = vmatprep.subr.bf16.mxu1 %v352_v58  ;;  %v333_v57 = vld [vmem:[#allocation2 + $0xe0] sm:$0xff]  ;;  %v335_v58 = vld [vmem:[#allocation2 + $0xf0] sm:$0xff] }
 0x27a   :  { %882 = vmatprep.mubr.bf16.mxu0 %v2849_v3  ;;  %923 = vmatprep.mubr.bf16.mxu1 %v2849_v3 }
 0x27c   :  { %853 = vmatpush1.bf16.msra.mxu0 %v349_v59  ;;  %894 = vmatpush1.bf16.msra.mxu1 %v351_v60  ;;  %v366_v59 = vld [vmem:[#allocation2 + $0x1e8] sm:$0xff]  ;;  %v368_v60 = vld [vmem:[#allocation2 + $0x1f8] sm:$0xff] }
 0x27d   :  { %854 = vmatprep.subr.bf16.mxu0 %v382_v61  ;;  %895 = vmatprep.subr.bf16.mxu1 %v384_v62  ;;  %v365_v61 = vld [vmem:[#allocation2 + $0x1e0] sm:$0xff]  ;;  %v367_v62 = vld [vmem:[#allocation2 + $0x1f0] sm:$0xff] }
 0x280   :  { %855 = vmatpush1.bf16.msra.mxu0 %v381_v63  ;;  %896 = vmatpush1.bf16.msra.mxu1 %v383_v0  ;;  %v398_v63 = vld [vmem:[#allocation2 + $0x2e8] sm:$0xff]  ;;  %v400_v0 = vld [vmem:[#allocation2 + $0x2f8] sm:$0xff] }
 0x281   :  { %856 = vmatprep.subr.bf16.mxu0 %v414_v1  ;;  %897 = vmatprep.subr.bf16.mxu1 %v416_v2  ;;  %v397_v1 = vld [vmem:[#allocation2 + $0x2e0] sm:$0xff]  ;;  %v399_v2 = vld [vmem:[#allocation2 + $0x2f0] sm:$0xff] }
 0x284   :  { %857 = vmatpush1.bf16.msra.mxu0 %v413_v4  ;;  %898 = vmatpush1.bf16.msra.mxu1 %v415_v5  ;;  %v430_v4 = vld [vmem:[#allocation2 + $0x3e8] sm:$0xff]  ;;  %v432_v5 = vld [vmem:[#allocation2 + $0x3f8] sm:$0xff] }
 0x285   :  { %932 = vmatprep.subr.bf16.mxu0 %v322_v6  ;;  %973 = vmatprep.subr.bf16.mxu1 %v324_v7  ;;  %v429_v6 = vld [vmem:[#allocation2 + $0x3e0] sm:$0xff]  ;;  %v431_v7 = vld [vmem:[#allocation2 + $0x3f0] sm:$0xff] }
 0x287   :  { %2490 = vmatmul.mubr.msk.bf16.vlgmr.msra.gmra.mrb[16].mxu0 %vm272_vm4, %v2969_v22  ;;  %2491 = vmatmul.mubr.msk.bf16.vlgmr.msra.gmra.mrb[16].mxu1 %vm272_vm4, %v2969_v22 }
 0x288   :  { %933 = vmatpush1.bf16.msra.mxu0 %v321_v8  ;;  %974 = vmatpush1.bf16.msra.mxu1 %v323_v9 }
 0x289   :  { %934 = vmatprep.subr.bf16.mxu0 %v354_v10  ;;  %975 = vmatprep.subr.bf16.mxu1 %v356_v11  ;;  %v433_v11 = vld [vmem:[#allocation6] sm:$0xff] }
 0x28a   :  { %964 = vmatprep.mubr.bf16.mxu0 %v2849_v3  ;;  %1005 = vmatprep.mubr.bf16.mxu1 %v2849_v3 }
 0x28c   :  { %935 = vmatpush1.bf16.msra.mxu0 %v353_v12  ;;  %976 = vmatpush1.bf16.msra.mxu1 %v355_v13 }
 0x28d   :  { %936 = vmatprep.subr.bf16.mxu0 %v386_v14  ;;  %977 = vmatprep.subr.bf16.mxu1 %v388_v15 }
 0x290   :  { %937 = vmatpush1.bf16.msra.mxu0 %v385_v16  ;;  %978 = vmatpush1.bf16.msra.mxu1 %v387_v17 }
 0x291   :  { %938 = vmatprep.subr.bf16.mxu0 %v418_v18  ;;  %979 = vmatprep.subr.bf16.mxu1 %v420_v19 }
 0x294   :  { %939 = vmatpush1.bf16.msra.mxu0 %v417_v20  ;;  %980 = vmatpush1.bf16.msra.mxu1 %v419_v21 }
 0x295   :  { %1014 = vmatprep.subr.bf16.mxu0 %v326_v23  ;;  %1055 = vmatprep.subr.bf16.mxu1 %v328_v24 }
 0x297   :  { %2492 = vmatmul.mubr.msk.bf16.vlgmr.msra.gmra.mrb[20].mxu0 %vm272_vm4, %v2969_v22  ;;  %2493 = vmatmul.mubr.msk.bf16.vlgmr.msra.gmra.mrb[20].mxu1 %vm272_vm4, %v2969_v22 }
 0x298   :  { %1015 = vmatpush1.bf16.msra.mxu0 %v325_v25  ;;  %1056 = vmatpush1.bf16.msra.mxu1 %v327_v26 }
 0x299   :  { %1016 = vmatprep.subr.bf16.mxu0 %v358_v27  ;;  %1057 = vmatprep.subr.bf16.mxu1 %v360_v28 }
 0x29a   :  { %1046 = vmatprep.mubr.bf16.mxu0 %v2849_v3  ;;  %1087 = vmatprep.mubr.bf16.mxu1 %v2849_v3 }
 0x29c   :  { %1017 = vmatpush1.bf16.msra.mxu0 %v357_v29  ;;  %1058 = vmatpush1.bf16.msra.mxu1 %v359_v30 }
 0x29d   :  { %1018 = vmatprep.subr.bf16.mxu0 %v390_v31  ;;  %1059 = vmatprep.subr.bf16.mxu1 %v392_v32 }
 0x2a0   :  { %1019 = vmatpush1.bf16.msra.mxu0 %v389_v33  ;;  %1060 = vmatpush1.bf16.msra.mxu1 %v391_v34 }
 0x2a1   :  { %1020 = vmatprep.subr.bf16.mxu0 %v422_v35  ;;  %1061 = vmatprep.subr.bf16.mxu1 %v424_v36 }
 0x2a4   :  { %1021 = vmatpush1.bf16.msra.mxu0 %v421_v37  ;;  %1062 = vmatpush1.bf16.msra.mxu1 %v423_v38 }
 0x2a5   :  { %1096 = vmatprep.subr.bf16.mxu0 %v330_v39  ;;  %1137 = vmatprep.subr.bf16.mxu1 %v332_v40 }
 0x2a7   :  { %2494 = vmatmul.mubr.msk.bf16.vlgmr.msra.gmra.mrb[24].mxu0 %vm272_vm4, %v2969_v22  ;;  %2495 = vmatmul.mubr.msk.bf16.vlgmr.msra.gmra.mrb[24].mxu1 %vm272_vm4, %v2969_v22 }
 0x2a8   :  { %1097 = vmatpush1.bf16.msra.mxu0 %v329_v41  ;;  %1138 = vmatpush1.bf16.msra.mxu1 %v331_v42 }
 0x2a9   :  { %1098 = vmatprep.subr.bf16.mxu0 %v362_v43  ;;  %1139 = vmatprep.subr.bf16.mxu1 %v364_v44 }
 0x2aa   :  { %1128 = vmatprep.mubr.bf16.mxu0 %v2849_v3  ;;  %1169 = vmatprep.mubr.bf16.mxu1 %v2849_v3 }
 0x2ac   :  { %1099 = vmatpush1.bf16.msra.mxu0 %v361_v45  ;;  %1140 = vmatpush1.bf16.msra.mxu1 %v363_v46 }
 0x2ad   :  { %1100 = vmatprep.subr.bf16.mxu0 %v394_v47  ;;  %1141 = vmatprep.subr.bf16.mxu1 %v396_v48 }
 0x2b0   :  { %1101 = vmatpush1.bf16.msra.mxu0 %v393_v49  ;;  %1142 = vmatpush1.bf16.msra.mxu1 %v395_v50 }
 0x2b1   :  { %1102 = vmatprep.subr.bf16.mxu0 %v426_v51  ;;  %1143 = vmatprep.subr.bf16.mxu1 %v428_v52 }
 0x2b4   :  { %1103 = vmatpush1.bf16.msra.mxu0 %v425_v53  ;;  %1144 = vmatpush1.bf16.msra.mxu1 %v427_v54 }
 0x2b5   :  { %1178 = vmatprep.subr.bf16.mxu0 %v334_v55  ;;  %1219 = vmatprep.subr.bf16.mxu1 %v336_v56 }
 0x2b7   :  { %2496 = vmatmul.mubr.msk.bf16.vlgmr.msra.gmra.mrb[28].mxu0 %vm272_vm4, %v2969_v22  ;;  %2497 = vmatmul.mubr.msk.bf16.vlgmr.msra.gmra.mrb[28].mxu1 %vm272_vm4, %v2969_v22 }
 0x2b8   :  { %1179 = vmatpush1.bf16.msra.mxu0 %v333_v57  ;;  %1220 = vmatpush1.bf16.msra.mxu1 %v335_v58 }
 0x2b9   :  { %1180 = vmatprep.subr.bf16.mxu0 %v366_v59  ;;  %1221 = vmatprep.subr.bf16.mxu1 %v368_v60 }
 0x2ba   :  { %1210 = vmatprep.mubr.bf16.mxu0 %v2849_v3  ;;  %1251 = vmatprep.mubr.bf16.mxu1 %v2849_v3  ;;  %v441_v3 = vlaneseq }
 0x2bc   :  { %1181 = vmatpush1.bf16.msra.mxu0 %v365_v61  ;;  %1222 = vmatpush1.bf16.msra.mxu1 %v367_v62  ;;  %v442_v8 = vshrl.u32 %v441_v3, 7 }
 0x2bd   :  { %1182 = vmatprep.subr.bf16.mxu0 %v398_v63  ;;  %1223 = vmatprep.subr.bf16.mxu1 %v400_v0 }
 0x2be   :  { %v3017_v9 = vsub.s32 0, %v442_v8  ;;  %v3019_v10 = vsub.s32 2, %v442_v8  ;;  %v3021_v12 = vsub.s32 1, %v442_v8  ;;  %v3023_v13 = vsub.s32 3, %v442_v8 }
 0x2bf   :  { %v3045_v42 = vsub.s32 4, %v442_v8  ;;  %v3047_v43 = vsub.s32 6, %v442_v8  ;;  %v3049_v44 = vsub.s32 5, %v442_v8  ;;  %v3051_v45 = vsub.s32 7, %v442_v8 }
 0x2c0   :  { %1183 = vmatpush1.bf16.msra.mxu0 %v397_v1  ;;  %1224 = vmatpush1.bf16.msra.mxu1 %v399_v2  ;;  %v444_v14 = vrot.slane %v433_v11, %v3017_v9  ;;  %v452_v15 = vrot.slane %v433_v11, %v3019_v10  ;;  %v448_v16 = vrot.slane %v433_v11, %v3021_v12 }
 0x2c1   :  { %1184 = vmatprep.subr.bf16.mxu0 %v430_v4  ;;  %1225 = vmatprep.subr.bf16.mxu1 %v432_v5  ;;  %v456_v17 = vrot.slane %v433_v11, %v3023_v13  ;;  %v460_v46 = vrot.slane %v433_v11, %v3045_v42  ;;  %v468_v47 = vrot.slane %v433_v11, %v3047_v43 }
 0x2c2   :  { %v464_v48 = vrot.slane %v433_v11, %v3049_v44  ;;  %v472_v49 = vrot.slane %v433_v11, %v3051_v45 }
 0x2c4   :  { %1185 = vmatpush1.bf16.msra.mxu0 %v429_v6  ;;  %1226 = vmatpush1.bf16.msra.mxu1 %v431_v7 }
 0x2c7   :  { %2498 = vmatmul.mubr.msk.bf16.vlgmr.msra.gmra.mrb[32].mxu0 %vm272_vm4, %v2969_v22  ;;  %2499 = vmatmul.mubr.msk.bf16.vlgmr.msra.gmra.mrb[32].mxu1 %vm272_vm4, %v2969_v22 }
 0x32a   :  { %v638_v22 = vpop.f32.mrb[4].mxu0  ;;  %v679_v18 = vpop.f32.mrb[4].mxu1 }
 0x32b   :  { %v639_v19 = vadd.f32 %v638_v22, %v444_v14  ;;  %v680_v20 = vadd.f32 %v679_v18, %v452_v15  ;;  %v640_v21 = vpop.f32.mrb[5].mxu0  ;;  %v681_v23 = vpop.f32.mrb[5].mxu1  ;;  %v434_v14 = vld [vmem:[#allocation6 + $0x8] sm:$0xff] }
 0x32c   :  { %v641_v24 = vadd.f32 %v640_v21, %v448_v16  ;;  %v682_v25 = vadd.f32 %v681_v23, %v456_v17  ;;  %v642_v26 = vpop.f32.mrb[6].mxu0  ;;  %v683_v27 = vpop.f32.mrb[6].mxu1  ;;  %v476_v15 = vrot.slane %v434_v14, %v3017_v9  ;;  %v484_v16 = vrot.slane %v434_v14, %v3019_v10 }
 0x32d   :  { %vm1260_vm6 = vcmp.gt.f32.partialorder %v639_v19, 0.0  ;;  %v1292_v28 = vmul.f32 0.2, %v639_v19  ;;  %vm1262_vm7 = vcmp.gt.f32.partialorder %v680_v20, 0.0  ;;  %v1294_v29 = vmul.f32 0.2, %v680_v20 }
 0x32e   :  { %vm1261_vm8 = vcmp.gt.f32.partialorder %v641_v24, 0.0  ;;  %v1293_v30 = vmul.f32 0.2, %v641_v24  ;;  %vm1263_vm9 = vcmp.gt.f32.partialorder %v682_v25, 0.0  ;;  %v1295_v31 = vmul.f32 0.2, %v682_v25 }
 0x32f   :  { %v3029_v32 = vsel %vm1260_vm6, %v639_v19, %v1292_v28  ;;  %v3031_v33 = vsel %vm1262_vm7, %v680_v20, %v1294_v29  ;;  %v643_v34 = vpop.f32.mrb[7].mxu0  ;;  %v684_v35 = vpop.f32.mrb[7].mxu1  ;;  %v480_v17 = vrot.slane %v434_v14, %v3021_v12  ;;  %v488_v22 = vrot.slane %v434_v14, %v3023_v13 }
 0x330   :  { %v1356_v36 = vpack.c.bf16 %v3029_v32, %v3029_v32  ;;  %v1358_v37 = vpack.c.bf16 %v3031_v33, %v3031_v33  ;;  %v3037_v38 = vsel %vm1261_vm8, %v641_v24, %v1293_v30  ;;  %v3039_v39 = vsel %vm1263_vm9, %v682_v25, %v1295_v31 }
 0x331   :  { %v1357_v40 = vpack.c.bf16 %v3037_v38, %v3037_v38  ;;  %v1359_v41 = vpack.c.bf16 %v3039_v39, %v3039_v39 }
 0x33a   :  { %v720_v50 = vpop.f32.mrb[8].mxu0  ;;  %v761_v51 = vpop.f32.mrb[8].mxu1 }
 0x33b   :  { %v721_v52 = vadd.f32 %v720_v50, %v460_v46  ;;  %v762_v53 = vadd.f32 %v761_v51, %v468_v47  ;;  %v722_v54 = vpop.f32.mrb[9].mxu0  ;;  %v763_v55 = vpop.f32.mrb[9].mxu1 }
 0x33c   :  { %v723_v56 = vadd.f32 %v722_v54, %v464_v48  ;;  %v764_v57 = vadd.f32 %v763_v55, %v472_v49  ;;  %v724_v58 = vpop.f32.mrb[10].mxu0  ;;  %v765_v59 = vpop.f32.mrb[10].mxu1  ;;  %v492_v55 = vrot.slane %v434_v14, %v3045_v42 }
 0x33d   :  { %vm1264_vm10 = vcmp.gt.f32.partialorder %v721_v52, 0.0  ;;  %v1296_v60 = vmul.f32 0.2, %v721_v52  ;;  %vm1266_vm11 = vcmp.gt.f32.partialorder %v762_v53, 0.0  ;;  %v1298_v61 = vmul.f32 0.2, %v762_v53 }
 0x33e   :  { %vm1265_vm12 = vcmp.gt.f32.partialorder %v723_v56, 0.0  ;;  %v1297_v62 = vmul.f32 0.2, %v723_v56  ;;  %vm1267_vm13 = vcmp.gt.f32.partialorder %v764_v57, 0.0  ;;  %v1299_v63 = vmul.f32 0.2, %v764_v57 }
 0x33f   :  { %v3057_v0 = vsel %vm1264_vm10, %v721_v52, %v1296_v60  ;;  %v3059_v1 = vsel %vm1266_vm11, %v762_v53, %v1298_v61  ;;  %v725_v2 = vpop.f32.mrb[11].mxu0  ;;  %v766_v4 = vpop.f32.mrb[11].mxu1  ;;  %v504_v58 = vrot.slane %v434_v14, %v3051_v45 }
 0x340   :  { %v1360_v5 = vpack.c.bf16 %v3057_v0, %v3057_v0  ;;  %v1362_v6 = vpack.c.bf16 %v3059_v1, %v3059_v1  ;;  %v3065_v7 = vsel %vm1265_vm12, %v723_v56, %v1297_v62  ;;  %v3067_v3 = vsel %vm1267_vm13, %v764_v57, %v1299_v63 }
 0x341   :  { %v1361_v8 = vpack.c.bf16 %v3065_v7, %v3065_v7  ;;  %v1363_v11 = vpack.c.bf16 %v3067_v3, %v3067_v3  ;;  %v500_v56 = vrot.slane %v434_v14, %v3047_v43  ;;  %v496_v57 = vrot.slane %v434_v14, %v3049_v44 }
 0x34a   :  { %v802_v18 = vpop.f32.mrb[12].mxu0  ;;  %v843_v19 = vpop.f32.mrb[12].mxu1 }
 0x34b   :  { %v803_v20 = vadd.f32 %v802_v18, %v476_v15  ;;  %v844_v21 = vadd.f32 %v843_v19, %v484_v16  ;;  %v804_v23 = vpop.f32.mrb[13].mxu0  ;;  %v845_v24 = vpop.f32.mrb[13].mxu1 }
 0x34c   :  { %v805_v25 = vadd.f32 %v804_v23, %v480_v17  ;;  %v846_v26 = vadd.f32 %v845_v24, %v488_v22  ;;  %v806_v27 = vpop.f32.mrb[14].mxu0  ;;  %v847_v28 = vpop.f32.mrb[14].mxu1 }
 0x34d   :  { %vm1268_vm14 = vcmp.gt.f32.partialorder %v803_v20, 0.0  ;;  %v1300_v29 = vmul.f32 0.2, %v803_v20  ;;  %vm1270_vm15 = vcmp.gt.f32.partialorder %v844_v21, 0.0  ;;  %v1302_v30 = vmul.f32 0.2, %v844_v21 }
 0x34e   :  { %vm1269_vm0 = vcmp.gt.f32.partialorder %v805_v25, 0.0  ;;  %v1301_v31 = vmul.f32 0.2, %v805_v25  ;;  %vm1271_vm1 = vcmp.gt.f32.partialorder %v846_v26, 0.0  ;;  %v1303_v34 = vmul.f32 0.2, %v846_v26 }
 0x34f   :  { %v3077_v35 = vsel %vm1268_vm14, %v803_v20, %v1300_v29  ;;  %v3079_v46 = vsel %vm1270_vm15, %v844_v21, %v1302_v30  ;;  %v807_v47 = vpop.f32.mrb[15].mxu0  ;;  %v848_v48 = vpop.f32.mrb[15].mxu1 }
 0x350   :  { %v1364_v49 = vpack.c.bf16 %v3077_v35, %v3077_v35  ;;  %v1366_v50 = vpack.c.bf16 %v3079_v46, %v3079_v46  ;;  %v3085_v51 = vsel %vm1269_vm0, %v805_v25, %v1301_v31  ;;  %v3087_v52 = vsel %vm1271_vm1, %v846_v26, %v1303_v34  ;;  %v435_v31 = vld [vmem:[#allocation6 + $0x10] sm:$0xff] }
 0x351   :  { %v1365_v53 = vpack.c.bf16 %v3085_v51, %v3085_v51  ;;  %v1367_v54 = vpack.c.bf16 %v3087_v52, %v3087_v52  ;;  %v508_v34 = vrot.slane %v435_v31, %v3017_v9  ;;  %v516_v47 = vrot.slane %v435_v31, %v3019_v10 }
 0x352   :  { %v512_v48 = vrot.slane %v435_v31, %v3021_v12 }
 0x35a   :  { %v884_v59 = vpop.f32.mrb[16].mxu0  ;;  %v925_v60 = vpop.f32.mrb[16].mxu1 }
 0x35b   :  { %v885_v61 = vadd.f32 %v884_v59, %v492_v55  ;;  %v926_v62 = vadd.f32 %v925_v60, %v500_v56  ;;  %v886_v63 = vpop.f32.mrb[17].mxu0  ;;  %v927_v2 = vpop.f32.mrb[17].mxu1  ;;  %v520_v55 = vrot.slane %v435_v31, %v3023_v13 }
 0x35c   :  { %v887_v4 = vadd.f32 %v886_v63, %v496_v57  ;;  %v928_v15 = vadd.f32 %v927_v2, %v504_v58  ;;  %v888_v16 = vpop.f32.mrb[18].mxu0  ;;  %v929_v17 = vpop.f32.mrb[18].mxu1 }
 0x35d   :  { %vm1272_vm2 = vcmp.gt.f32.partialorder %v885_v61, 0.0  ;;  %v1304_v22 = vmul.f32 0.2, %v885_v61  ;;  %vm1274_vm3 = vcmp.gt.f32.partialorder %v926_v62, 0.0  ;;  %v1306_v18 = vmul.f32 0.2, %v926_v62 }
 0x35e   :  { %vm1273_vm4 = vcmp.gt.f32.partialorder %v887_v4, 0.0  ;;  %v1305_v19 = vmul.f32 0.2, %v887_v4  ;;  %vm1275_vm5 = vcmp.gt.f32.partialorder %v928_v15, 0.0  ;;  %v1307_v20 = vmul.f32 0.2, %v928_v15 }
 0x35f   :  { %v3097_v21 = vsel %vm1272_vm2, %v885_v61, %v1304_v22  ;;  %v3099_v14 = vsel %vm1274_vm3, %v926_v62, %v1306_v18  ;;  %v889_v23 = vpop.f32.mrb[19].mxu0  ;;  %v930_v24 = vpop.f32.mrb[19].mxu1 }
 0x360   :  { %v3105_v27 = vsel %vm1273_vm4, %v887_v4, %v1305_v19  ;;  %v3107_v28 = vsel %vm1275_vm5, %v928_v15, %v1307_v20 }
 0x361   :  { %v1369_v29 = vpack.c.bf16 %v3105_v27, %v3105_v27 }
 0x36a   :  { %v966_v56 = vpop.f32.mrb[20].mxu0  ;;  %v1007_v57 = vpop.f32.mrb[20].mxu1 }
 0x36b   :  { %v967_v58 = vadd.f32 %v966_v56, %v508_v34  ;;  %v1008_v59 = vadd.f32 %v1007_v57, %v516_v47  ;;  %v968_v60 = vpop.f32.mrb[21].mxu0  ;;  %v1009_v61 = vpop.f32.mrb[21].mxu1  ;;  %v524_v57 = vrot.slane %v435_v31, %v3045_v42 }
 0x36c   :  { %v969_v62 = vadd.f32 %v968_v60, %v512_v48  ;;  %v1010_v63 = vadd.f32 %v1009_v61, %v520_v55  ;;  %v970_v2 = vpop.f32.mrb[22].mxu0  ;;  %v1011_v4 = vpop.f32.mrb[22].mxu1  ;;  %v536_v60 = vrot.slane %v435_v31, %v3051_v45 }
 0x36d   :  { %vm1276_vm6 = vcmp.gt.f32.partialorder %v967_v58, 0.0  ;;  %v1308_v15 = vmul.f32 0.2, %v967_v58  ;;  %vm1278_vm7 = vcmp.gt.f32.partialorder %v1008_v59, 0.0  ;;  %v1310_v16 = vmul.f32 0.2, %v1008_v59 }
 0x36e   :  { %vm1277_vm8 = vcmp.gt.f32.partialorder %v969_v62, 0.0  ;;  %v1309_v17 = vmul.f32 0.2, %v969_v62  ;;  %vm1279_vm9 = vcmp.gt.f32.partialorder %v1010_v63, 0.0  ;;  %v1311_v22 = vmul.f32 0.2, %v1010_v63 }
 0x36f   :  { %v3117_v18 = vsel %vm1276_vm6, %v967_v58, %v1308_v15  ;;  %v3119_v19 = vsel %vm1278_vm7, %v1008_v59, %v1310_v16  ;;  %v971_v20 = vpop.f32.mrb[23].mxu0  ;;  %v1012_v23 = vpop.f32.mrb[23].mxu1  ;;  %v532_v58 = vrot.slane %v435_v31, %v3047_v43  ;;  %v528_v59 = vrot.slane %v435_v31, %v3049_v44 }
 0x370   :  { %v3125_v47 = vsel %vm1277_vm8, %v969_v62, %v1309_v17  ;;  %v3127_v48 = vsel %vm1279_vm9, %v1010_v63, %v1311_v22 }
 0x37a   :  { %v1048_v61 = vpop.f32.mrb[24].mxu0  ;;  %v1089_v2 = vpop.f32.mrb[24].mxu1 }
 0x37b   :  { %v1049_v62 = vadd.f32 %v1048_v61, %v524_v57  ;;  %v1090_v4 = vadd.f32 %v1089_v2, %v532_v58  ;;  %v1050_v63 = vpop.f32.mrb[25].mxu0  ;;  %v1091_v15 = vpop.f32.mrb[25].mxu1 }
 0x37c   :  { %v1051_v16 = vadd.f32 %v1050_v63, %v528_v59  ;;  %v1092_v17 = vadd.f32 %v1091_v15, %v536_v60  ;;  %v1052_v22 = vpop.f32.mrb[26].mxu0  ;;  %v1093_v20 = vpop.f32.mrb[26].mxu1 }
 0x37d   :  { %vm1280_vm10 = vcmp.gt.f32.partialorder %v1049_v62, 0.0  ;;  %v1312_v23 = vmul.f32 0.2, %v1049_v62  ;;  %vm1282_vm11 = vcmp.gt.f32.partialorder %v1090_v4, 0.0  ;;  %v1314_v34 = vmul.f32 0.2, %v1090_v4 }
 0x37e   :  { %vm1281_vm12 = vcmp.gt.f32.partialorder %v1051_v16, 0.0  ;;  %v1313_v56 = vmul.f32 0.2, %v1051_v16  ;;  %vm1283_vm13 = vcmp.gt.f32.partialorder %v1092_v17, 0.0  ;;  %v1315_v24 = vmul.f32 0.2, %v1092_v17 }
 0x37f   :  { %v3137_v55 = vsel %vm1280_vm10, %v1049_v62, %v1312_v23  ;;  %v3139_v31 = vsel %vm1282_vm11, %v1090_v4, %v1314_v34  ;;  %v1053_v57 = vpop.f32.mrb[27].mxu0  ;;  %v1094_v58 = vpop.f32.mrb[27].mxu1  ;;  %v436_v34 = vld [vmem:[#allocation6 + $0x18] sm:$0xff] }
 0x380   :  { %v3145_v61 = vsel %vm1281_vm12, %v1051_v16, %v1313_v56  ;;  %v3147_v2 = vsel %vm1283_vm13, %v1092_v17, %v1315_v24  ;;  %v540_v4 = vrot.slane %v436_v34, %v3017_v9  ;;  %v548_v15 = vrot.slane %v436_v34, %v3019_v10 }
 0x381   :  { %v544_v22 = vrot.slane %v436_v34, %v3021_v12  ;;  %v552_v20 = vrot.slane %v436_v34, %v3023_v13 }
 0x38a   :  { %v1130_v23 = vpop.f32.mrb[28].mxu0  ;;  %v1171_v56 = vpop.f32.mrb[28].mxu1 }
 0x38b   :  { %v1131_v16 = vadd.f32 %v1130_v23, %v540_v4  ;;  %v1172_v24 = vadd.f32 %v1171_v56, %v548_v15  ;;  %v1132_v17 = vpop.f32.mrb[29].mxu0  ;;  %v1173_v57 = vpop.f32.mrb[29].mxu1  ;;  %v564_v56 = vrot.slane %v436_v34, %v3047_v43 }
 0x38c   :  { %v1133_v58 = vadd.f32 %v1132_v17, %v544_v22  ;;  %v1174_v60 = vadd.f32 %v1173_v57, %v552_v20  ;;  %v1134_v59 = vpop.f32.mrb[30].mxu0  ;;  %v1175_v63 = vpop.f32.mrb[30].mxu1 }
 0x38d   :  { %vm1284_vm14 = vcmp.gt.f32.partialorder %v1131_v16, 0.0  ;;  %v1316_v62 = vmul.f32 0.2, %v1131_v16  ;;  %vm1286_vm15 = vcmp.gt.f32.partialorder %v1172_v24, 0.0  ;;  %v1318_v26 = vmul.f32 0.2, %v1172_v24 }
 0x38e   :  { %vm1285_vm0 = vcmp.gt.f32.partialorder %v1133_v58, 0.0  ;;  %v1317_v10 = vmul.f32 0.2, %v1133_v58  ;;  %vm1287_vm1 = vcmp.gt.f32.partialorder %v1174_v60, 0.0  ;;  %v1319_v25 = vmul.f32 0.2, %v1174_v60 }
 0x38f   :  { %v3157_v30 = vsel %vm1284_vm14, %v1131_v16, %v1316_v62  ;;  %v3159_v13 = vsel %vm1286_vm15, %v1172_v24, %v1318_v26  ;;  %v1135_v4 = vpop.f32.mrb[31].mxu0  ;;  %v1176_v15 = vpop.f32.mrb[31].mxu1  ;;  %v556_v26 = vrot.slane %v436_v34, %v3045_v42  ;;  %v560_v16 = vrot.slane %v436_v34, %v3049_v44 }
 0x390   :  { %v3165_v63 = vsel %vm1285_vm0, %v1133_v58, %v1317_v10  ;;  %v3167_v20 = vsel %vm1287_vm1, %v1174_v60, %v1319_v25  ;;  %v568_v24 = vrot.slane %v436_v34, %v3051_v45 }
 0x39a   :  { %v1212_v17 = vpop.f32.mrb[32].mxu0  ;;  %v1253_v57 = vpop.f32.mrb[32].mxu1 }
 0x39b   :  { %v1213_v58 = vadd.f32 %v1212_v17, %v556_v26  ;;  %v1254_v10 = vadd.f32 %v1253_v57, %v564_v56  ;;  %v1214_v25 = vpop.f32.mrb[33].mxu0  ;;  %v1255_v60 = vpop.f32.mrb[33].mxu1 }
 0x39c   :  { %v1215_v4 = vadd.f32 %v1214_v25, %v560_v16  ;;  %v1256_v15 = vadd.f32 %v1255_v60, %v568_v24  ;;  %v1216_v59 = vpop.f32.mrb[34].mxu0  ;;  %v1257_v22 = vpop.f32.mrb[34].mxu1 }
 0x39d   :  { %vm1288_vm2 = vcmp.gt.f32.partialorder %v1213_v58, 0.0  ;;  %v1320_v62 = vmul.f32 0.2, %v1213_v58  ;;  %vm1290_vm3 = vcmp.gt.f32.partialorder %v1254_v10, 0.0  ;;  %v1322_v42 = vmul.f32 0.2, %v1254_v10 }
 0x39e   :  { %vm1289_vm4 = vcmp.gt.f32.partialorder %v1215_v4, 0.0  ;;  %v1321_v43 = vmul.f32 0.2, %v1215_v4  ;;  %vm1291_vm5 = vcmp.gt.f32.partialorder %v1256_v15, 0.0  ;;  %v1323_v44 = vmul.f32 0.2, %v1256_v15 }
 0x39f   :  { %v3177_v23 = vsel %vm1288_vm2, %v1213_v58, %v1320_v62  ;;  %v3179_v45 = vsel %vm1290_vm3, %v1254_v10, %v1322_v42  ;;  %v1217_v34 = vpop.f32.mrb[35].mxu0  ;;  %v1258_v26 = vpop.f32.mrb[35].mxu1 }
 0x3a0   :  { %v1384_v56 = vpack.c.bf16 %v3177_v23, %v3177_v23  ;;  %v1386_v22 = vpack.c.bf16 %v3179_v45, %v3179_v45  ;;  %v3185_v59 = vsel %vm1289_vm4, %v1215_v4, %v1321_v43  ;;  %v3187_v16 = vsel %vm1291_vm5, %v1256_v15, %v1323_v44 }
 0x3a1   :  { %v1385_v24 = vpack.c.bf16 %v3185_v59, %v3185_v59  ;;  %v1387_v62 = vpack.c.bf16 %v3187_v16, %v3187_v16 }
 0x3a2   :  { %2826 = dma.done.wait [#allocation5 + $0x1], 16384 }
 0x3a3   :  { %2827 = vsyncadd [#allocation5 + $0x1], 4294950912  ;;  %1559 = vmatprep.mubr.bf16.mxu0 %v1357_v40  ;;  %1599 = vmatprep.mubr.bf16.mxu1 %v1359_v41  ;;  %v1400_v17 = vld [vmem:[#allocation3 + $0x40] sm:$0xff]  ;;  %v1401_v25 = vld [vmem:[#allocation3 + $0x48] sm:$0xff]  ;;  %v3309_v35 = vpack.c.bf16 %v3107_v28, %v3107_v28 }
 0x3a4   :  { %v1416_v57 = vld [vmem:[#allocation3 + $0xc0] sm:$0xff]  ;;  %2509 = vmatprep.subr.bf16.mxu0 %v1400_v17  ;;  %v1417_v60 = vld [vmem:[#allocation3 + $0xc8] sm:$0xff]  ;;  %v1402_v38 = vld [vmem:[#allocation3 + $0x50] sm:$0xff] }
 0x3a5   :  { %v1392_v58 = vld [vmem:[#allocation3] sm:$0xff]  ;;  %2531 = vmatprep.subr.bf16.mxu1 %v1416_v57  ;;  %v1393_v4 = vld [vmem:[#allocation3 + $0x8] sm:$0xff]  ;;  %v1418_v40 = vld [vmem:[#allocation3 + $0xd0] sm:$0xff] }
 0x3a6   :  { %v1408_v10 = vld [vmem:[#allocation3 + $0x80] sm:$0xff]  ;;  %2510 = vmatpush3.bf16.msra.mxu0 %v1392_v58  ;;  %v1409_v15 = vld [vmem:[#allocation3 + $0x88] sm:$0xff]  ;;  %v1394_v39 = vld [vmem:[#allocation3 + $0x10] sm:$0xff] }
 0x3a7   :  { %2532 = vmatpush3.bf16.msra.mxu1 %v1408_v10  ;;  %2511 = vmatprep.subr.bf16.mxu0 %v1401_v25  ;;  %v1410_v41 = vld [vmem:[#allocation3 + $0x90] sm:$0xff]  ;;  %v1403_v42 = vld [vmem:[#allocation3 + $0x58] sm:$0xff]  ;;  %v1404_v26 = vld [vmem:[#allocation3 + $0x60] sm:$0xff] }
 0x3a8   :  { %2533 = vmatprep.subr.bf16.mxu1 %v1417_v60  ;;  %v1419_v43 = vld [vmem:[#allocation3 + $0xd8] sm:$0xff]  ;;  %v1420_v17 = vld [vmem:[#allocation3 + $0xe0] sm:$0xff]  ;;  %v1405_v10 = vld [vmem:[#allocation3 + $0x68] sm:$0xff] }
 0x3a9   :  { %v1395_v44 = vld [vmem:[#allocation3 + $0x18] sm:$0xff]  ;;  %v1396_v57 = vld [vmem:[#allocation3 + $0x20] sm:$0xff]  ;;  %v1421_v25 = vld [vmem:[#allocation3 + $0xe8] sm:$0xff] }
 0x3aa   :  { %2512 = vmatpush3.bf16.msra.mxu0 %v1393_v4  ;;  %v1411_v34 = vld [vmem:[#allocation3 + $0x98] sm:$0xff]  ;;  %v1412_v58 = vld [vmem:[#allocation3 + $0xa0] sm:$0xff]  ;;  %v1397_v60 = vld [vmem:[#allocation3 + $0x28] sm:$0xff] }
 0x3ab   :  { %2534 = vmatpush3.bf16.msra.mxu1 %v1409_v15  ;;  %2513 = vmatprep.subr.bf16.mxu0 %v1402_v38  ;;  %v1413_v4 = vld [vmem:[#allocation3 + $0xa8] sm:$0xff]  ;;  %v1406_v15 = vld [vmem:[#allocation3 + $0x70] sm:$0xff]  ;;  %v1436_v7 = vld [vmem:[#allocation3 + $0x160] sm:$0xff] }
 0x3ac   :  { %2535 = vmatprep.subr.bf16.mxu1 %v1418_v40  ;;  %v1422_v38 = vld [vmem:[#allocation3 + $0xf0] sm:$0xff]  ;;  %v1428_v3 = vld [vmem:[#allocation3 + $0x120] sm:$0xff] }
 0x3ad   :  { %v1398_v40 = vld [vmem:[#allocation3 + $0x30] sm:$0xff]  ;;  %v1468_v51 = vld [vmem:[#allocation3 + $0x260] sm:$0xff] }
 0x3ae   :  { %2514 = vmatpush3.bf16.msra.mxu0 %v1394_v39  ;;  %v1414_v39 = vld [vmem:[#allocation3 + $0xb0] sm:$0xff]  ;;  %v1460_v52 = vld [vmem:[#allocation3 + $0x220] sm:$0xff] }
 0x3af   :  { %2536 = vmatpush3.bf16.msra.mxu1 %v1410_v41  ;;  %2515 = vmatprep.subr.bf16.mxu0 %v1403_v42  ;;  %v1407_v41 = vld [vmem:[#allocation3 + $0x78] sm:$0xff]  ;;  %v1426_v32 = vld [vmem:[#allocation3 + $0x110] sm:$0xff]  ;;  %v1500_v27 = vld [vmem:[#allocation3 + $0x360] sm:$0xff] }
 0x3b0   :  { %2537 = vmatprep.subr.bf16.mxu1 %v1419_v43  ;;  %v1423_v42 = vld [vmem:[#allocation3 + $0xf8] sm:$0xff]  ;;  %v1442_v33 = vld [vmem:[#allocation3 + $0x190] sm:$0xff]  ;;  %v1492_v28 = vld [vmem:[#allocation3 + $0x320] sm:$0xff] }
 0x3b1   :  { %v1399_v43 = vld [vmem:[#allocation3 + $0x38] sm:$0xff]  ;;  %v1458_v0 = vld [vmem:[#allocation3 + $0x210] sm:$0xff] }
 0x3b2   :  { %2516 = vmatpush3.bf16.msra.mxu0 %v1395_v44  ;;  %v1415_v44 = vld [vmem:[#allocation3 + $0xb8] sm:$0xff]  ;;  %v1474_v1 = vld [vmem:[#allocation3 + $0x290] sm:$0xff] }
 0x3b3   :  { %2538 = vmatpush3.bf16.msra.mxu1 %v1411_v34  ;;  %2517 = vmatprep.subr.bf16.mxu0 %v1404_v26  ;;  %v1432_v34 = vld [vmem:[#allocation3 + $0x140] sm:$0xff]  ;;  %v1490_v46 = vld [vmem:[#allocation3 + $0x310] sm:$0xff] }
 0x3b4   :  { %2539 = vmatprep.subr.bf16.mxu1 %v1420_v17  ;;  %v1448_v26 = vld [vmem:[#allocation3 + $0x1c0] sm:$0xff] }
 0x3b5   :  { %v1424_v17 = vld [vmem:[#allocation3 + $0x100] sm:$0xff] }
 0x3b6   :  { %2518 = vmatpush3.bf16.msra.mxu0 %v1396_v57  ;;  %v1440_v57 = vld [vmem:[#allocation3 + $0x180] sm:$0xff] }
 0x3b7   :  { %2540 = vmatpush3.bf16.msra.mxu1 %v1412_v58  ;;  %2519 = vmatprep.subr.bf16.mxu0 %v1405_v10  ;;  %v1433_v58 = vld [vmem:[#allocation3 + $0x148] sm:$0xff] }
 0x3b8   :  { %2541 = vmatprep.subr.bf16.mxu1 %v1421_v25  ;;  %v1449_v10 = vld [vmem:[#allocation3 + $0x1c8] sm:$0xff] }
 0x3b9   :  { %v1425_v25 = vld [vmem:[#allocation3 + $0x108] sm:$0xff] }
 0x3ba   :  { %2520 = vmatpush3.bf16.msra.mxu0 %v1397_v60  ;;  %v1441_v60 = vld [vmem:[#allocation3 + $0x188] sm:$0xff] }
 0x3bb   :  { %2542 = vmatpush3.bf16.msra.mxu1 %v1413_v4  ;;  %2521 = vmatprep.subr.bf16.mxu0 %v1406_v15  ;;  %v1434_v4 = vld [vmem:[#allocation3 + $0x150] sm:$0xff] }
 0x3bc   :  { %2543 = vmatprep.subr.bf16.mxu1 %v1422_v38  ;;  %v1450_v15 = vld [vmem:[#allocation3 + $0x1d0] sm:$0xff]  ;;  %v1427_v38 = vld [vmem:[#allocation3 + $0x118] sm:$0xff] }
 0x3be   :  { %2522 = vmatpush3.bf16.msra.mxu0 %v1398_v40  ;;  %v1443_v40 = vld [vmem:[#allocation3 + $0x198] sm:$0xff] }
 0x3bf   :  { %2544 = vmatpush3.bf16.msra.mxu1 %v1414_v39  ;;  %2523 = vmatprep.subr.bf16.mxu0 %v1407_v41  ;;  %v1437_v39 = vld [vmem:[#allocation3 + $0x168] sm:$0xff] }
 0x3c0   :  { %2545 = vmatprep.subr.bf16.mxu1 %v1423_v42  ;;  %v1453_v41 = vld [vmem:[#allocation3 + $0x1e8] sm:$0xff] }
 0x3c1   :  { %v1429_v42 = vld [vmem:[#allocation3 + $0x128] sm:$0xff] }
 0x3c2   :  { %2524 = vmatpush3.bf16.msra.mxu0 %v1399_v43  ;;  %v1445_v43 = vld [vmem:[#allocation3 + $0x1a8] sm:$0xff] }
 0x3c3   :  { %2546 = vmatpush3.bf16.msra.mxu1 %v1415_v44  ;;  %2553 = vmatprep.subr.bf16.mxu0 %v1432_v34  ;;  %v1438_v44 = vld [vmem:[#allocation3 + $0x170] sm:$0xff] }
 0x3c4   :  { %2575 = vmatprep.subr.bf16.mxu1 %v1448_v26  ;;  %v1454_v34 = vld [vmem:[#allocation3 + $0x1f0] sm:$0xff] }
 0x3c5   :  { %1560 = vmatmul.mubr.bf16.vlgmr.msra.gmra.mrb[36].mxu0 %v1356_v36  ;;  %v1435_v36 = vld [vmem:[#allocation3 + $0x158] sm:$0xff]  ;;  %v1430_v26 = vld [vmem:[#allocation3 + $0x130] sm:$0xff] }
 0x3c6   :  { %1600 = vmatmul.mubr.bf16.vlgmr.msra.gmra.mrb[36].mxu1 %v1358_v37  ;;  %2554 = vmatpush3.bf16.msra.mxu0 %v1424_v17  ;;  %v1451_v37 = vld [vmem:[#allocation3 + $0x1d8] sm:$0xff]  ;;  %v1446_v17 = vld [vmem:[#allocation3 + $0x1b0] sm:$0xff] }
 0x3c7   :  { %2576 = vmatpush3.bf16.msra.mxu1 %v1440_v57  ;;  %2555 = vmatprep.subr.bf16.mxu0 %v1433_v58  ;;  %v1439_v57 = vld [vmem:[#allocation3 + $0x178] sm:$0xff] }
 0x3c8   :  { %2577 = vmatprep.subr.bf16.mxu1 %v1449_v10  ;;  %1639 = vmatprep.mubr.bf16.mxu0 %v1361_v8  ;;  %v1452_v8 = vld [vmem:[#allocation3 + $0x1e0] sm:$0xff]  ;;  %v1455_v58 = vld [vmem:[#allocation3 + $0x1f8] sm:$0xff] }
 0x3c9   :  { %1679 = vmatprep.mubr.bf16.mxu1 %v1363_v11  ;;  %v1444_v11 = vld [vmem:[#allocation3 + $0x1a0] sm:$0xff]  ;;  %v1431_v10 = vld [vmem:[#allocation3 + $0x138] sm:$0xff] }
 0x3ca   :  { %2556 = vmatpush3.bf16.msra.mxu0 %v1425_v25  ;;  %v1447_v25 = vld [vmem:[#allocation3 + $0x1b8] sm:$0xff] }
 0x3cb   :  { %2578 = vmatpush3.bf16.msra.mxu1 %v1441_v60  ;;  %2557 = vmatprep.subr.bf16.mxu0 %v1434_v4  ;;  %v1464_v60 = vld [vmem:[#allocation3 + $0x240] sm:$0xff] }
 0x3cc   :  { %2579 = vmatprep.subr.bf16.mxu1 %v1450_v15  ;;  %v1480_v4 = vld [vmem:[#allocation3 + $0x2c0] sm:$0xff] }
 0x3cd   :  { %v1456_v15 = vld [vmem:[#allocation3 + $0x200] sm:$0xff] }
 0x3ce   :  { %2558 = vmatpush3.bf16.msra.mxu0 %v1426_v32  ;;  %v1472_v32 = vld [vmem:[#allocation3 + $0x280] sm:$0xff] }
 0x3cf   :  { %2580 = vmatpush3.bf16.msra.mxu1 %v1442_v33  ;;  %2559 = vmatprep.subr.bf16.mxu0 %v1435_v36  ;;  %v1465_v33 = vld [vmem:[#allocation3 + $0x248] sm:$0xff] }
 0x3d0   :  { %2581 = vmatprep.subr.bf16.mxu1 %v1451_v37  ;;  %v1481_v36 = vld [vmem:[#allocation3 + $0x2c8] sm:$0xff] }
 0x3d1   :  { %v1457_v37 = vld [vmem:[#allocation3 + $0x208] sm:$0xff] }
 0x3d2   :  { %2560 = vmatpush3.bf16.msra.mxu0 %v1427_v38  ;;  %v1473_v38 = vld [vmem:[#allocation3 + $0x288] sm:$0xff] }
 0x3d3   :  { %2582 = vmatpush3.bf16.msra.mxu1 %v1443_v40  ;;  %2561 = vmatprep.subr.bf16.mxu0 %v1436_v7  ;;  %v1466_v40 = vld [vmem:[#allocation3 + $0x250] sm:$0xff] }
 0x3d4   :  { %2583 = vmatprep.subr.bf16.mxu1 %v1452_v8  ;;  %v1482_v7 = vld [vmem:[#allocation3 + $0x2d0] sm:$0xff]  ;;  %v1459_v8 = vld [vmem:[#allocation3 + $0x218] sm:$0xff] }
 0x3d6   :  { %2562 = vmatpush3.bf16.msra.mxu0 %v1428_v3  ;;  %v1475_v3 = vld [vmem:[#allocation3 + $0x298] sm:$0xff] }
 0x3d7   :  { %2584 = vmatpush3.bf16.msra.mxu1 %v1444_v11  ;;  %2563 = vmatprep.subr.bf16.mxu0 %v1437_v39  ;;  %v1469_v11 = vld [vmem:[#allocation3 + $0x268] sm:$0xff] }
 0x3d8   :  { %2585 = vmatprep.subr.bf16.mxu1 %v1453_v41  ;;  %v1485_v39 = vld [vmem:[#allocation3 + $0x2e8] sm:$0xff] }
 0x3d9   :  { %v1461_v41 = vld [vmem:[#allocation3 + $0x228] sm:$0xff] }
 0x3da   :  { %2564 = vmatpush3.bf16.msra.mxu0 %v1429_v42  ;;  %v1477_v42 = vld [vmem:[#allocation3 + $0x2a8] sm:$0xff] }
 0x3db   :  { %2586 = vmatpush3.bf16.msra.mxu1 %v1445_v43  ;;  %2565 = vmatprep.subr.bf16.mxu0 %v1438_v44  ;;  %v1470_v43 = vld [vmem:[#allocation3 + $0x270] sm:$0xff] }
 0x3dc   :  { %2587 = vmatprep.subr.bf16.mxu1 %v1454_v34  ;;  %v1486_v44 = vld [vmem:[#allocation3 + $0x2f0] sm:$0xff] }
 0x3dd   :  { %v1462_v34 = vld [vmem:[#allocation3 + $0x230] sm:$0xff] }
 0x3de   :  { %2566 = vmatpush3.bf16.msra.mxu0 %v1430_v26  ;;  %v1478_v26 = vld [vmem:[#allocation3 + $0x2b0] sm:$0xff] }
 0x3df   :  { %2588 = vmatpush3.bf16.msra.mxu1 %v1446_v17  ;;  %2567 = vmatprep.subr.bf16.mxu0 %v1439_v57  ;;  %v1471_v17 = vld [vmem:[#allocation3 + $0x278] sm:$0xff] }
 0x3e0   :  { %2589 = vmatprep.subr.bf16.mxu1 %v1455_v58  ;;  %v1487_v57 = vld [vmem:[#allocation3 + $0x2f8] sm:$0xff] }
 0x3e1   :  { %v1463_v58 = vld [vmem:[#allocation3 + $0x238] sm:$0xff] }
 0x3e2   :  { %2568 = vmatpush3.bf16.msra.mxu0 %v1431_v10  ;;  %v1479_v10 = vld [vmem:[#allocation3 + $0x2b8] sm:$0xff] }
 0x3e3   :  { %2590 = vmatpush3.bf16.msra.mxu1 %v1447_v25  ;;  %2597 = vmatprep.subr.bf16.mxu0 %v1464_v60  ;;  %v1496_v25 = vld [vmem:[#allocation3 + $0x340] sm:$0xff] }
 0x3e4   :  { %2619 = vmatprep.subr.bf16.mxu1 %v1480_v4  ;;  %v1512_v60 = vld [vmem:[#allocation3 + $0x3c0] sm:$0xff] }
 0x3e5   :  { %1640 = vmatmul.mubr.bf16.vlgmr.msra.gmra.mrb[40].mxu0 %v1360_v5  ;;  %v1467_v5 = vld [vmem:[#allocation3 + $0x258] sm:$0xff]  ;;  %v1488_v4 = vld [vmem:[#allocation3 + $0x300] sm:$0xff] }
 0x3e6   :  { %1680 = vmatmul.mubr.bf16.vlgmr.msra.gmra.mrb[40].mxu1 %v1362_v6  ;;  %2598 = vmatpush3.bf16.msra.mxu0 %v1456_v15  ;;  %v1483_v6 = vld [vmem:[#allocation3 + $0x2d8] sm:$0xff]  ;;  %v1504_v15 = vld [vmem:[#allocation3 + $0x380] sm:$0xff] }
 0x3e7   :  { %2620 = vmatpush3.bf16.msra.mxu1 %v1472_v32  ;;  %2599 = vmatprep.subr.bf16.mxu0 %v1465_v33  ;;  %v1497_v32 = vld [vmem:[#allocation3 + $0x348] sm:$0xff] }
 0x3e8   :  { %2621 = vmatprep.subr.bf16.mxu1 %v1481_v36  ;;  %1719 = vmatprep.mubr.bf16.mxu0 %v1365_v53  ;;  %v1484_v53 = vld [vmem:[#allocation3 + $0x2e0] sm:$0xff]  ;;  %v1513_v33 = vld [vmem:[#allocation3 + $0x3c8] sm:$0xff] }
 0x3e9   :  { %1759 = vmatprep.mubr.bf16.mxu1 %v1367_v54  ;;  %v1476_v54 = vld [vmem:[#allocation3 + $0x2a0] sm:$0xff]  ;;  %v1489_v36 = vld [vmem:[#allocation3 + $0x308] sm:$0xff] }
 0x3ea   :  { %2600 = vmatpush3.bf16.msra.mxu0 %v1457_v37  ;;  %v1505_v37 = vld [vmem:[#allocation3 + $0x388] sm:$0xff] }
 0x3eb   :  { %2622 = vmatpush3.bf16.msra.mxu1 %v1473_v38  ;;  %2601 = vmatprep.subr.bf16.mxu0 %v1466_v40  ;;  %v1498_v38 = vld [vmem:[#allocation3 + $0x350] sm:$0xff] }
 0x3ec   :  { %2623 = vmatprep.subr.bf16.mxu1 %v1482_v7  ;;  %v1514_v40 = vld [vmem:[#allocation3 + $0x3d0] sm:$0xff]  ;;  %v1515_v7 = vld [vmem:[#allocation3 + $0x3d8] sm:$0xff] }
 0x3ee   :  { %2602 = vmatpush3.bf16.msra.mxu0 %v1458_v0  ;;  %v1491_v0 = vld [vmem:[#allocation3 + $0x318] sm:$0xff] }
 0x3ef   :  { %2624 = vmatpush3.bf16.msra.mxu1 %v1474_v1  ;;  %2603 = vmatprep.subr.bf16.mxu0 %v1467_v5  ;;  %v1507_v1 = vld [vmem:[#allocation3 + $0x398] sm:$0xff]  ;;  %v1508_v5 = vld [vmem:[#allocation3 + $0x3a0] sm:$0xff] }
 0x3f0   :  { %2625 = vmatprep.subr.bf16.mxu1 %v1483_v6  ;;  %v1501_v6 = vld [vmem:[#allocation3 + $0x368] sm:$0xff] }
 0x3f2   :  { %2604 = vmatpush3.bf16.msra.mxu0 %v1459_v8  ;;  %v1517_v8 = vld [vmem:[#allocation3 + $0x3e8] sm:$0xff] }
 0x3f3   :  { %2626 = vmatpush3.bf16.msra.mxu1 %v1475_v3  ;;  %2605 = vmatprep.subr.bf16.mxu0 %v1468_v51  ;;  %v1493_v3 = vld [vmem:[#allocation3 + $0x328] sm:$0xff] }
 0x3f4   :  { %2627 = vmatprep.subr.bf16.mxu1 %v1484_v53  ;;  %v1509_v51 = vld [vmem:[#allocation3 + $0x3a8] sm:$0xff]  ;;  %v1502_v53 = vld [vmem:[#allocation3 + $0x370] sm:$0xff] }
 0x3f6   :  { %2606 = vmatpush3.bf16.msra.mxu0 %v1460_v52  ;;  %v1518_v52 = vld [vmem:[#allocation3 + $0x3f0] sm:$0xff] }
 0x3f7   :  { %2628 = vmatpush3.bf16.msra.mxu1 %v1476_v54  ;;  %2607 = vmatprep.subr.bf16.mxu0 %v1469_v11  ;;  %v1494_v54 = vld [vmem:[#allocation3 + $0x330] sm:$0xff] }
 0x3f8   :  { %2629 = vmatprep.subr.bf16.mxu1 %v1485_v39  ;;  %v1510_v11 = vld [vmem:[#allocation3 + $0x3b0] sm:$0xff]  ;;  %v1503_v39 = vld [vmem:[#allocation3 + $0x378] sm:$0xff] }
 0x3fa   :  { %2608 = vmatpush3.bf16.msra.mxu0 %v1461_v41  ;;  %v1519_v41 = vld [vmem:[#allocation3 + $0x3f8] sm:$0xff] }
 0x3fb   :  { %2630 = vmatpush3.bf16.msra.mxu1 %v1477_v42  ;;  %2609 = vmatprep.subr.bf16.mxu0 %v1470_v43  ;;  %v1495_v42 = vld [vmem:[#allocation3 + $0x338] sm:$0xff] }
 0x3fc   :  { %2631 = vmatprep.subr.bf16.mxu1 %v1486_v44  ;;  %v1511_v43 = vld [vmem:[#allocation3 + $0x3b8] sm:$0xff]  ;;  %v3310_v44 = vpack.c.bf16 %v3097_v21, %v3097_v21 }
 0x3fe   :  { %2610 = vmatpush3.bf16.msra.mxu0 %v1462_v34  ;;  %v3311_v34 = vpack.c.bf16 %v3099_v14, %v3099_v14 }
 0x3ff   :  { %2632 = vmatpush3.bf16.msra.mxu1 %v1478_v26  ;;  %2611 = vmatprep.subr.bf16.mxu0 %v1471_v17 }
 0x400   :  { %2633 = vmatprep.subr.bf16.mxu1 %v1487_v57  ;;  %v2500_v57 = vld [vmem:[#allocation8] ss:$0 sm:$0xff] }
 0x402   :  { %2612 = vmatpush3.bf16.msra.mxu0 %v1463_v58 }
 0x403   :  { %2634 = vmatpush3.bf16.msra.mxu1 %v1479_v10  ;;  %2641 = vmatprep.subr.bf16.mxu0 %v1496_v25 }
 0x404   :  { %2663 = vmatprep.subr.bf16.mxu1 %v1512_v60 }
 0x405   :  { %1720 = vmatmul.mubr.bf16.vlgmr.msra.gmra.mrb[44].mxu0 %v1364_v49  ;;  %v1506_v49 = vld [vmem:[#allocation3 + $0x390] sm:$0xff] }
 0x406   :  { %1760 = vmatmul.mubr.bf16.vlgmr.msra.gmra.mrb[44].mxu1 %v1366_v50  ;;  %2642 = vmatpush3.bf16.msra.mxu0 %v1488_v4  ;;  %v1499_v50 = vld [vmem:[#allocation3 + $0x358] sm:$0xff] }
 0x407   :  { %2664 = vmatpush3.bf16.msra.mxu1 %v1504_v15  ;;  %2643 = vmatprep.subr.bf16.mxu0 %v1497_v32 }
 0x408   :  { %2665 = vmatprep.subr.bf16.mxu1 %v1513_v33  ;;  %1799 = vmatprep.mubr.bf16.mxu0 %v1369_v29  ;;  %v1516_v29 = vld [vmem:[#allocation3 + $0x3e0] sm:$0xff] }
 0x409   :  { %1839 = vmatprep.mubr.bf16.mxu1 %v3309_v35 }
 0x40a   :  { %2644 = vmatpush3.bf16.msra.mxu0 %v1489_v36 }
 0x40b   :  { %2666 = vmatpush3.bf16.msra.mxu1 %v1505_v37  ;;  %2645 = vmatprep.subr.bf16.mxu0 %v1498_v38 }
 0x40c   :  { %2667 = vmatprep.subr.bf16.mxu1 %v1514_v40 }
 0x40e   :  { %2646 = vmatpush3.bf16.msra.mxu0 %v1490_v46 }
 0x40f   :  { %2668 = vmatpush3.bf16.msra.mxu1 %v1506_v49  ;;  %2647 = vmatprep.subr.bf16.mxu0 %v1499_v50 }
 0x410   :  { %2669 = vmatprep.subr.bf16.mxu1 %v1515_v7 }
 0x412   :  { %2648 = vmatpush3.bf16.msra.mxu0 %v1491_v0 }
 0x413   :  { %2670 = vmatpush3.bf16.msra.mxu1 %v1507_v1  ;;  %2649 = vmatprep.subr.bf16.mxu0 %v1500_v27 }
 0x414   :  { %2671 = vmatprep.subr.bf16.mxu1 %v1516_v29 }
 0x416   :  { %2650 = vmatpush3.bf16.msra.mxu0 %v1492_v28 }
 0x417   :  { %2672 = vmatpush3.bf16.msra.mxu1 %v1508_v5  ;;  %2651 = vmatprep.subr.bf16.mxu0 %v1501_v6 }
 0x418   :  { %2673 = vmatprep.subr.bf16.mxu1 %v1517_v8 }
 0x41a   :  { %2652 = vmatpush3.bf16.msra.mxu0 %v1493_v3 }
 0x41b   :  { %2674 = vmatpush3.bf16.msra.mxu1 %v1509_v51  ;;  %2653 = vmatprep.subr.bf16.mxu0 %v1502_v53 }
 0x41c   :  { %2675 = vmatprep.subr.bf16.mxu1 %v1518_v52 }
 0x41e   :  { %2654 = vmatpush3.bf16.msra.mxu0 %v1494_v54 }
 0x41f   :  { %2676 = vmatpush3.bf16.msra.mxu1 %v1510_v11  ;;  %2655 = vmatprep.subr.bf16.mxu0 %v1503_v39 }
 0x420   :  { %2677 = vmatprep.subr.bf16.mxu1 %v1519_v41 }
 0x422   :  { %2656 = vmatpush3.bf16.msra.mxu0 %v1495_v42 }
 0x423   :  { %2678 = vmatpush3.bf16.msra.mxu1 %v1511_v43 }
 0x425   :  { %1800 = vmatmul.mubr.bf16.vlgmr.msra.gmra.mrb[48].mxu0 %v3310_v44 }
 0x426   :  { %1840 = vmatmul.mubr.bf16.vlgmr.msra.gmra.mrb[48].mxu1 %v3311_v34 }
 0x498   :  { %v2525_v26 = vpop.f32.mrb[36].mxu0 }
 0x499   :  { %v2547_v17 = vpop.f32.mrb[36].mxu1  ;;  %v2526_v58 = vpop.f32.mrb[37].mxu0 }
 0x49a   :  { %v2548_v10 = vpop.f32.mrb[37].mxu1  ;;  %v2527_v25 = vadd.f32 %v2526_v58, %v2525_v26  ;;  %v2528_v4 = vpop.f32.mrb[38].mxu0 }
 0x49b   :  { %v2549_v60 = vadd.f32 %v2548_v10, %v2547_v17  ;;  %v2550_v15 = vpop.f32.mrb[38].mxu1  ;;  %v2529_v32 = vpop.f32.mrb[39].mxu0 }
 0x49c   :  { %v2551_v33 = vpop.f32.mrb[39].mxu1  ;;  %v1562_v36 = vadd.f32 %v2527_v25, %v2500_v57 }
 0x49e   :  { %v1602_v37 = vadd.f32 %v2549_v60, %v1562_v36 }
 0x4b8   :  { %v2569_v38 = vpop.f32.mrb[40].mxu0 }
 0x4b9   :  { %v2591_v21 = vpop.f32.mrb[40].mxu1  ;;  %v2570_v40 = vpop.f32.mrb[41].mxu0 }
 0x4ba   :  { %v2592_v35 = vpop.f32.mrb[41].mxu1  ;;  %v2571_v46 = vadd.f32 %v2570_v40, %v2569_v38  ;;  %v2572_v49 = vpop.f32.mrb[42].mxu0 }
 0x4bb   :  { %v2593_v14 = vadd.f32 %v2592_v35, %v2591_v21  ;;  %v2594_v50 = vpop.f32.mrb[42].mxu1  ;;  %v2573_v7 = vpop.f32.mrb[43].mxu0 }
 0x4bc   :  { %v2595_v0 = vpop.f32.mrb[43].mxu1  ;;  %v1642_v1 = vadd.f32 %v2571_v46, %v1602_v37 }
 0x4be   :  { %v1682_v27 = vadd.f32 %v2593_v14, %v1642_v1 }
 0x4d8   :  { %v2613_v29 = vpop.f32.mrb[44].mxu0 }
 0x4d9   :  { %v2635_v28 = vpop.f32.mrb[44].mxu1  ;;  %v2614_v5 = vpop.f32.mrb[45].mxu0 }
 0x4da   :  { %v2636_v6 = vpop.f32.mrb[45].mxu1  ;;  %v2615_v8 = vadd.f32 %v2614_v5, %v2613_v29  ;;  %v2616_v51 = vpop.f32.mrb[46].mxu0 }
 0x4db   :  { %v2637_v3 = vadd.f32 %v2636_v6, %v2635_v28  ;;  %v2638_v53 = vpop.f32.mrb[46].mxu1  ;;  %v2617_v52 = vpop.f32.mrb[47].mxu0 }
 0x4dc   :  { %v2639_v54 = vpop.f32.mrb[47].mxu1  ;;  %v1722_v11 = vadd.f32 %v2615_v8, %v1682_v27 }
 0x4de   :  { %v1762_v39 = vadd.f32 %v2637_v3, %v1722_v11 }
 0x4f8   :  { %v2657_v41 = vpop.f32.mrb[48].mxu0 }
 0x4f9   :  { %v2679_v42 = vpop.f32.mrb[48].mxu1  ;;  %v2658_v43 = vpop.f32.mrb[49].mxu0 }
 0x4fa   :  { %v2680_v44 = vpop.f32.mrb[49].mxu1  ;;  %v2659_v34 = vadd.f32 %v2658_v43, %v2657_v41  ;;  %v2660_v17 = vpop.f32.mrb[50].mxu0 }
 0x4fb   :  { %v2681_v26 = vadd.f32 %v2680_v44, %v2679_v42  ;;  %v2682_v57 = vpop.f32.mrb[50].mxu1  ;;  %v2661_v58 = vpop.f32.mrb[51].mxu0 }
 0x4fc   :  { %v2683_v10 = vpop.f32.mrb[51].mxu1  ;;  %v1802_v25 = vadd.f32 %v2659_v34, %v1762_v39 }
 0x4fe   :  { %v1842_v60 = vadd.f32 %v2681_v26, %v1802_v25 }
 0x500   :  { %1847 = vst [vmem:[%s3308_s8] sm:$0xff] %v1842_v60 }
 0x501   :  { %2828 = dma.done.wait [#allocation5 + $0x2], 32768 }
 0x502   :  { %2829 = vsyncadd [#allocation5 + $0x2], 4294934528  ;;  %v3312_v4 = vpack.c.bf16 %v3125_v47, %v3125_v47  ;;  %v3313_v15 = vpack.c.bf16 %v3165_v63, %v3165_v63  ;;  %v1852_v32 = vld [vmem:[#allocation4 + $0x8] sm:$0xff]  ;;  %v1851_v36 = vld [vmem:[#allocation4] sm:$0xff] }
 0x503   :  { %v1980_v33 = vld [vmem:[#allocation4 + $0x408] sm:$0xff]  ;;  %2119 = vmatprep.subr.bf16.mxu1 %v1852_v32  ;;  %v1979_v37 = vld [vmem:[#allocation4 + $0x400] sm:$0xff]  ;;  %v1854_v38 = vld [vmem:[#allocation4 + $0x18] sm:$0xff] }
 0x504   :  { %2151 = vmatprep.mubr.bf16.mxu1 %v3312_v4  ;;  %2315 = vmatprep.mubr.bf16.mxu0 %v3313_v15  ;;  %v1982_v21 = vld [vmem:[#allocation4 + $0x418] sm:$0xff]  ;;  %v1853_v40 = vld [vmem:[#allocation4 + $0x10] sm:$0xff]  ;;  %v1856_v47 = vld [vmem:[#allocation4 + $0x28] sm:$0xff] }
 0x505   :  { %2283 = vmatprep.subr.bf16.mxu0 %v1980_v33  ;;  %2120 = vmatpush1.bf16.msra.mxu1 %v1851_v36  ;;  %v1981_v35 = vld [vmem:[#allocation4 + $0x410] sm:$0xff]  ;;  %v1984_v46 = vld [vmem:[#allocation4 + $0x428] sm:$0xff]  ;;  %v1855_v63 = vld [vmem:[#allocation4 + $0x20] sm:$0xff] }
 0x506   :  { %2284 = vmatpush1.bf16.msra.mxu0 %v1979_v37  ;;  %2121 = vmatprep.subr.bf16.mxu1 %v1854_v38  ;;  %v1983_v14 = vld [vmem:[#allocation4 + $0x420] sm:$0xff]  ;;  %v1858_v49 = vld [vmem:[#allocation4 + $0x38] sm:$0xff]  ;;  %v1857_v7 = vld [vmem:[#allocation4 + $0x30] sm:$0xff] }
 0x507   :  { %2285 = vmatprep.subr.bf16.mxu0 %v1982_v21  ;;  %v1986_v50 = vld [vmem:[#allocation4 + $0x438] sm:$0xff]  ;;  %v1985_v0 = vld [vmem:[#allocation4 + $0x430] sm:$0xff]  ;;  %v1860_v1 = vld [vmem:[#allocation4 + $0x48] sm:$0xff] }
 0x508   :  { %v1988_v27 = vld [vmem:[#allocation4 + $0x448] sm:$0xff]  ;;  %v1859_v29 = vld [vmem:[#allocation4 + $0x40] sm:$0xff]  ;;  %v1862_v5 = vld [vmem:[#allocation4 + $0x58] sm:$0xff] }
 0x509   :  { %2122 = vmatpush1.bf16.msra.mxu1 %v1853_v40  ;;  %v1987_v28 = vld [vmem:[#allocation4 + $0x440] sm:$0xff]  ;;  %v1990_v6 = vld [vmem:[#allocation4 + $0x458] sm:$0xff]  ;;  %v1861_v8 = vld [vmem:[#allocation4 + $0x50] sm:$0xff] }
 0x50a   :  { %2286 = vmatpush1.bf16.msra.mxu0 %v1981_v35  ;;  %2123 = vmatprep.subr.bf16.mxu1 %v1856_v47  ;;  %v1989_v3 = vld [vmem:[#allocation4 + $0x450] sm:$0xff]  ;;  %v1864_v51 = vld [vmem:[#allocation4 + $0x68] sm:$0xff]  ;;  %v1863_v52 = vld [vmem:[#allocation4 + $0x60] sm:$0xff] }
 0x50b   :  { %2287 = vmatprep.subr.bf16.mxu0 %v1984_v46  ;;  %v1992_v53 = vld [vmem:[#allocation4 + $0x468] sm:$0xff]  ;;  %v1991_v54 = vld [vmem:[#allocation4 + $0x460] sm:$0xff]  ;;  %v1866_v11 = vld [vmem:[#allocation4 + $0x78] sm:$0xff] }
 0x50c   :  { %v1994_v39 = vld [vmem:[#allocation4 + $0x478] sm:$0xff]  ;;  %v1865_v41 = vld [vmem:[#allocation4 + $0x70] sm:$0xff]  ;;  %v1868_v43 = vld [vmem:[#allocation4 + $0x88] sm:$0xff] }
 0x50d   :  { %2124 = vmatpush1.bf16.msra.mxu1 %v1855_v63  ;;  %v1993_v42 = vld [vmem:[#allocation4 + $0x470] sm:$0xff]  ;;  %v1996_v44 = vld [vmem:[#allocation4 + $0x488] sm:$0xff]  ;;  %v1867_v34 = vld [vmem:[#allocation4 + $0x80] sm:$0xff] }
 0x50e   :  { %2288 = vmatpush1.bf16.msra.mxu0 %v1983_v14  ;;  %2125 = vmatprep.subr.bf16.mxu1 %v1858_v49  ;;  %v1995_v26 = vld [vmem:[#allocation4 + $0x480] sm:$0xff]  ;;  %v1870_v17 = vld [vmem:[#allocation4 + $0x98] sm:$0xff]  ;;  %v1869_v58 = vld [vmem:[#allocation4 + $0x90] sm:$0xff] }
 0x50f   :  { %2289 = vmatprep.subr.bf16.mxu0 %v1986_v50  ;;  %v1998_v57 = vld [vmem:[#allocation4 + $0x498] sm:$0xff]  ;;  %v1997_v10 = vld [vmem:[#allocation4 + $0x490] sm:$0xff]  ;;  %v1872_v25 = vld [vmem:[#allocation4 + $0xa8] sm:$0xff] }
 0x510   :  { %v2000_v60 = vld [vmem:[#allocation4 + $0x4a8] sm:$0xff]  ;;  %v1871_v4 = vld [vmem:[#allocation4 + $0xa0] sm:$0xff]  ;;  %v1874_v32 = vld [vmem:[#allocation4 + $0xb8] sm:$0xff] }
 0x511   :  { %2126 = vmatpush1.bf16.msra.mxu1 %v1857_v7  ;;  %v1999_v15 = vld [vmem:[#allocation4 + $0x4a0] sm:$0xff]  ;;  %v2002_v33 = vld [vmem:[#allocation4 + $0x4b8] sm:$0xff]  ;;  %v1873_v36 = vld [vmem:[#allocation4 + $0xb0] sm:$0xff] }
 0x512   :  { %2290 = vmatpush1.bf16.msra.mxu0 %v1985_v0  ;;  %2127 = vmatprep.subr.bf16.mxu1 %v1860_v1  ;;  %v2001_v37 = vld [vmem:[#allocation4 + $0x4b0] sm:$0xff]  ;;  %v1876_v38 = vld [vmem:[#allocation4 + $0xc8] sm:$0xff]  ;;  %v1875_v40 = vld [vmem:[#allocation4 + $0xc0] sm:$0xff] }
 0x513   :  { %2291 = vmatprep.subr.bf16.mxu0 %v1988_v27  ;;  %v2004_v21 = vld [vmem:[#allocation4 + $0x4c8] sm:$0xff]  ;;  %v2003_v35 = vld [vmem:[#allocation4 + $0x4c0] sm:$0xff]  ;;  %v1878_v47 = vld [vmem:[#allocation4 + $0xd8] sm:$0xff] }
 0x514   :  { %v2006_v46 = vld [vmem:[#allocation4 + $0x4d8] sm:$0xff]  ;;  %v1877_v63 = vld [vmem:[#allocation4 + $0xd0] sm:$0xff]  ;;  %v1880_v49 = vld [vmem:[#allocation4 + $0xe8] sm:$0xff] }
 0x515   :  { %2128 = vmatpush1.bf16.msra.mxu1 %v1859_v29  ;;  %v2005_v14 = vld [vmem:[#allocation4 + $0x4d0] sm:$0xff]  ;;  %v2008_v50 = vld [vmem:[#allocation4 + $0x4e8] sm:$0xff]  ;;  %v1879_v7 = vld [vmem:[#allocation4 + $0xe0] sm:$0xff] }
 0x516   :  { %2292 = vmatpush1.bf16.msra.mxu0 %v1987_v28  ;;  %2129 = vmatprep.subr.bf16.mxu1 %v1862_v5  ;;  %v2007_v0 = vld [vmem:[#allocation4 + $0x4e0] sm:$0xff]  ;;  %v1882_v1 = vld [vmem:[#allocation4 + $0xf8] sm:$0xff]  ;;  %v1881_v29 = vld [vmem:[#allocation4 + $0xf0] sm:$0xff] }
 0x517   :  { %2293 = vmatprep.subr.bf16.mxu0 %v1990_v6  ;;  %v2010_v27 = vld [vmem:[#allocation4 + $0x4f8] sm:$0xff]  ;;  %v2009_v28 = vld [vmem:[#allocation4 + $0x4f0] sm:$0xff]  ;;  %v1884_v5 = vld [vmem:[#allocation4 + $0x108] sm:$0xff] }
 0x518   :  { %v2012_v6 = vld [vmem:[#allocation4 + $0x508] sm:$0xff]  ;;  %v1923_v59 = vld [vmem:[#allocation4 + $0x240] sm:$0xff] }
 0x519   :  { %2130 = vmatpush1.bf16.msra.mxu1 %v1861_v8  ;;  %v1883_v8 = vld [vmem:[#allocation4 + $0x100] sm:$0xff] }
 0x51a   :  { %2294 = vmatpush1.bf16.msra.mxu0 %v1989_v3  ;;  %2131 = vmatprep.subr.bf16.mxu1 %v1864_v51  ;;  %v2011_v3 = vld [vmem:[#allocation4 + $0x500] sm:$0xff]  ;;  %v1886_v51 = vld [vmem:[#allocation4 + $0x118] sm:$0xff] }
 0x51b   :  { %2295 = vmatprep.subr.bf16.mxu0 %v1992_v53  ;;  %v2014_v53 = vld [vmem:[#allocation4 + $0x518] sm:$0xff]  ;;  %v2079_v23 = vld [vmem:[#allocation4 + $0x720] sm:$0xff] }
 0x51c   :  { %v1955_v16 = vld [vmem:[#allocation4 + $0x340] sm:$0xff] }
 0x51d   :  { %2132 = vmatpush1.bf16.msra.mxu1 %v1863_v52  ;;  %v3314_v52 = vpack.c.bf16 %v3117_v18, %v3117_v18  ;;  %v3317_v18 = vpack.c.bf16 %v3167_v20, %v3167_v20  ;;  %v1891_v20 = vld [vmem:[#allocation4 + $0x140] sm:$0xff] }
 0x51e   :  { %2296 = vmatpush1.bf16.msra.mxu0 %v1991_v54  ;;  %2133 = vmatprep.subr.bf16.mxu1 %v1866_v11  ;;  %v3315_v54 = vpack.c.bf16 %v3157_v30, %v3157_v30  ;;  %v1885_v11 = vld [vmem:[#allocation4 + $0x110] sm:$0xff]  ;;  %v1887_v30 = vld [vmem:[#allocation4 + $0x120] sm:$0xff] }
 0x51f   :  { %2297 = vmatprep.subr.bf16.mxu0 %v1994_v39  ;;  %v2013_v39 = vld [vmem:[#allocation4 + $0x510] sm:$0xff] }
 0x521   :  { %2134 = vmatpush1.bf16.msra.mxu1 %v1865_v41  ;;  %v1888_v41 = vld [vmem:[#allocation4 + $0x128] sm:$0xff] }
 0x522   :  { %2298 = vmatpush1.bf16.msra.mxu0 %v1993_v42  ;;  %2135 = vmatprep.subr.bf16.mxu1 %v1868_v43  ;;  %v2016_v42 = vld [vmem:[#allocation4 + $0x528] sm:$0xff]  ;;  %v3316_v43 = vpack.c.bf16 %v3127_v48, %v3127_v48 }
 0x523   :  { %2299 = vmatprep.subr.bf16.mxu0 %v1996_v44  ;;  %v2015_v44 = vld [vmem:[#allocation4 + $0x520] sm:$0xff]  ;;  %v1892_v48 = vld [vmem:[#allocation4 + $0x148] sm:$0xff] }
 0x525   :  { %2136 = vmatpush1.bf16.msra.mxu1 %v1867_v34  ;;  %v1890_v34 = vld [vmem:[#allocation4 + $0x138] sm:$0xff] }
 0x526   :  { %2300 = vmatpush1.bf16.msra.mxu0 %v1995_v26  ;;  %2137 = vmatprep.subr.bf16.mxu1 %v1870_v17  ;;  %v2018_v26 = vld [vmem:[#allocation4 + $0x538] sm:$0xff]  ;;  %v1889_v17 = vld [vmem:[#allocation4 + $0x130] sm:$0xff] }
 0x527   :  { %2301 = vmatprep.subr.bf16.mxu0 %v1998_v57  ;;  %v2017_v57 = vld [vmem:[#allocation4 + $0x530] sm:$0xff] }
 0x529   :  { %2138 = vmatpush1.bf16.msra.mxu1 %v1869_v58  ;;  %v2020_v58 = vld [vmem:[#allocation4 + $0x548] sm:$0xff] }
 0x52a   :  { %2302 = vmatpush1.bf16.msra.mxu0 %v1997_v10  ;;  %2139 = vmatprep.subr.bf16.mxu1 %v1872_v25  ;;  %v2019_v10 = vld [vmem:[#allocation4 + $0x540] sm:$0xff]  ;;  %v1894_v25 = vld [vmem:[#allocation4 + $0x158] sm:$0xff] }
 0x52b   :  { %2303 = vmatprep.subr.bf16.mxu0 %v2000_v60  ;;  %v2022_v60 = vld [vmem:[#allocation4 + $0x558] sm:$0xff] }
 0x52d   :  { %2140 = vmatpush1.bf16.msra.mxu1 %v1871_v4  ;;  %v1893_v4 = vld [vmem:[#allocation4 + $0x150] sm:$0xff] }
 0x52e   :  { %2304 = vmatpush1.bf16.msra.mxu0 %v1999_v15  ;;  %2141 = vmatprep.subr.bf16.mxu1 %v1874_v32  ;;  %v2021_v15 = vld [vmem:[#allocation4 + $0x550] sm:$0xff]  ;;  %v1896_v32 = vld [vmem:[#allocation4 + $0x168] sm:$0xff] }
 0x52f   :  { %2305 = vmatprep.subr.bf16.mxu0 %v2002_v33  ;;  %v2024_v33 = vld [vmem:[#allocation4 + $0x568] sm:$0xff] }
 0x531   :  { %2142 = vmatpush1.bf16.msra.mxu1 %v1873_v36  ;;  %v1895_v36 = vld [vmem:[#allocation4 + $0x160] sm:$0xff] }
 0x532   :  { %2306 = vmatpush1.bf16.msra.mxu0 %v2001_v37  ;;  %2143 = vmatprep.subr.bf16.mxu1 %v1876_v38  ;;  %v2023_v37 = vld [vmem:[#allocation4 + $0x560] sm:$0xff]  ;;  %v1898_v38 = vld [vmem:[#allocation4 + $0x178] sm:$0xff] }
 0x533   :  { %2307 = vmatprep.subr.bf16.mxu0 %v2004_v21  ;;  %v2026_v21 = vld [vmem:[#allocation4 + $0x578] sm:$0xff] }
 0x535   :  { %2144 = vmatpush1.bf16.msra.mxu1 %v1875_v40  ;;  %v1897_v40 = vld [vmem:[#allocation4 + $0x170] sm:$0xff] }
 0x536   :  { %2308 = vmatpush1.bf16.msra.mxu0 %v2003_v35  ;;  %2145 = vmatprep.subr.bf16.mxu1 %v1878_v47  ;;  %v2025_v35 = vld [vmem:[#allocation4 + $0x570] sm:$0xff]  ;;  %v1900_v47 = vld [vmem:[#allocation4 + $0x188] sm:$0xff] }
 0x537   :  { %2309 = vmatprep.subr.bf16.mxu0 %v2006_v46  ;;  %v2028_v46 = vld [vmem:[#allocation4 + $0x588] sm:$0xff] }
 0x539   :  { %2146 = vmatpush1.bf16.msra.mxu1 %v1877_v63  ;;  %v1899_v63 = vld [vmem:[#allocation4 + $0x180] sm:$0xff] }
 0x53a   :  { %2310 = vmatpush1.bf16.msra.mxu0 %v2005_v14  ;;  %2147 = vmatprep.subr.bf16.mxu1 %v1880_v49  ;;  %v2027_v14 = vld [vmem:[#allocation4 + $0x580] sm:$0xff]  ;;  %v1902_v49 = vld [vmem:[#allocation4 + $0x198] sm:$0xff] }
 0x53b   :  { %2311 = vmatprep.subr.bf16.mxu0 %v2008_v50  ;;  %v2030_v50 = vld [vmem:[#allocation4 + $0x598] sm:$0xff] }
 0x53d   :  { %2148 = vmatpush1.bf16.msra.mxu1 %v1879_v7  ;;  %v1901_v7 = vld [vmem:[#allocation4 + $0x190] sm:$0xff] }
 0x53e   :  { %2312 = vmatpush1.bf16.msra.mxu0 %v2007_v0  ;;  %2149 = vmatprep.subr.bf16.mxu1 %v1882_v1  ;;  %v2029_v0 = vld [vmem:[#allocation4 + $0x590] sm:$0xff]  ;;  %v1904_v1 = vld [vmem:[#allocation4 + $0x1a8] sm:$0xff] }
 0x53f   :  { %2313 = vmatprep.subr.bf16.mxu0 %v2010_v27  ;;  %v2032_v27 = vld [vmem:[#allocation4 + $0x5a8] sm:$0xff] }
 0x541   :  { %2150 = vmatpush1.bf16.msra.mxu1 %v1881_v29  ;;  %v1903_v29 = vld [vmem:[#allocation4 + $0x1a0] sm:$0xff] }
 0x542   :  { %2314 = vmatpush1.bf16.msra.mxu0 %v2009_v28  ;;  %2160 = vmatprep.subr.bf16.mxu1 %v1884_v5  ;;  %v2031_v28 = vld [vmem:[#allocation4 + $0x5a0] sm:$0xff]  ;;  %v1906_v5 = vld [vmem:[#allocation4 + $0x1b8] sm:$0xff] }
 0x543   :  { %2324 = vmatprep.subr.bf16.mxu0 %v2012_v6  ;;  %v2034_v6 = vld [vmem:[#allocation4 + $0x5b8] sm:$0xff] }
 0x544   :  { %2152 = vmatmul.mubr.bf16.vlgmr.msra.gmra.mrb[52].mxu1 %v3314_v52  ;;  %v1907_v52 = vld [vmem:[#allocation4 + $0x1c0] sm:$0xff] }
 0x545   :  { %2316 = vmatmul.mubr.bf16.vlgmr.msra.gmra.mrb[52].mxu0 %v3315_v54  ;;  %2161 = vmatpush1.bf16.msra.mxu1 %v1883_v8  ;;  %v1905_v8 = vld [vmem:[#allocation4 + $0x1b0] sm:$0xff]  ;;  %v2035_v54 = vld [vmem:[#allocation4 + $0x5c0] sm:$0xff] }
 0x546   :  { %2325 = vmatpush1.bf16.msra.mxu0 %v2011_v3  ;;  %2162 = vmatprep.subr.bf16.mxu1 %v1886_v51  ;;  %v2033_v3 = vld [vmem:[#allocation4 + $0x5b0] sm:$0xff]  ;;  %v1908_v51 = vld [vmem:[#allocation4 + $0x1c8] sm:$0xff] }
 0x547   :  { %2326 = vmatprep.subr.bf16.mxu0 %v2014_v53  ;;  %2192 = vmatprep.mubr.bf16.mxu1 %v3316_v43  ;;  %v2036_v53 = vld [vmem:[#allocation4 + $0x5c8] sm:$0xff] }
 0x548   :  { %2356 = vmatprep.mubr.bf16.mxu0 %v3317_v18  ;;  %v1912_v43 = vld [vmem:[#allocation4 + $0x1e8] sm:$0xff] }
 0x549   :  { %2163 = vmatpush1.bf16.msra.mxu1 %v1885_v11  ;;  %v1910_v11 = vld [vmem:[#allocation4 + $0x1d8] sm:$0xff]  ;;  %v2040_v18 = vld [vmem:[#allocation4 + $0x5e8] sm:$0xff] }
 0x54a   :  { %2327 = vmatpush1.bf16.msra.mxu0 %v2013_v39  ;;  %2164 = vmatprep.subr.bf16.mxu1 %v1888_v41  ;;  %v2038_v39 = vld [vmem:[#allocation4 + $0x5d8] sm:$0xff]  ;;  %v1909_v41 = vld [vmem:[#allocation4 + $0x1d0] sm:$0xff] }
 0x54b   :  { %2328 = vmatprep.subr.bf16.mxu0 %v2016_v42  ;;  %v2037_v42 = vld [vmem:[#allocation4 + $0x5d0] sm:$0xff] }
 0x54d   :  { %2165 = vmatpush1.bf16.msra.mxu1 %v1887_v30  ;;  %v1911_v30 = vld [vmem:[#allocation4 + $0x1e0] sm:$0xff] }
 0x54e   :  { %2329 = vmatpush1.bf16.msra.mxu0 %v2015_v44  ;;  %2166 = vmatprep.subr.bf16.mxu1 %v1890_v34  ;;  %v2039_v44 = vld [vmem:[#allocation4 + $0x5e0] sm:$0xff]  ;;  %v1914_v34 = vld [vmem:[#allocation4 + $0x1f8] sm:$0xff] }
 0x54f   :  { %2330 = vmatprep.subr.bf16.mxu0 %v2018_v26  ;;  %v2042_v26 = vld [vmem:[#allocation4 + $0x5f8] sm:$0xff] }
 0x551   :  { %2167 = vmatpush1.bf16.msra.mxu1 %v1889_v17  ;;  %v1913_v17 = vld [vmem:[#allocation4 + $0x1f0] sm:$0xff] }
 0x552   :  { %2331 = vmatpush1.bf16.msra.mxu0 %v2017_v57  ;;  %2168 = vmatprep.subr.bf16.mxu1 %v1892_v48  ;;  %v2041_v57 = vld [vmem:[#allocation4 + $0x5f0] sm:$0xff]  ;;  %v1916_v48 = vld [vmem:[#allocation4 + $0x208] sm:$0xff] }
 0x553   :  { %2332 = vmatprep.subr.bf16.mxu0 %v2020_v58  ;;  %v2044_v58 = vld [vmem:[#allocation4 + $0x608] sm:$0xff] }
 0x555   :  { %2169 = vmatpush1.bf16.msra.mxu1 %v1891_v20  ;;  %v1915_v20 = vld [vmem:[#allocation4 + $0x200] sm:$0xff] }
 0x556   :  { %2333 = vmatpush1.bf16.msra.mxu0 %v2019_v10  ;;  %2170 = vmatprep.subr.bf16.mxu1 %v1894_v25  ;;  %v2043_v10 = vld [vmem:[#allocation4 + $0x600] sm:$0xff]  ;;  %v1918_v25 = vld [vmem:[#allocation4 + $0x218] sm:$0xff] }
 0x557   :  { %2334 = vmatprep.subr.bf16.mxu0 %v2022_v60  ;;  %v2046_v60 = vld [vmem:[#allocation4 + $0x618] sm:$0xff] }
 0x559   :  { %2171 = vmatpush1.bf16.msra.mxu1 %v1893_v4  ;;  %v3318_v4 = vpack.c.bf16 %v3119_v19, %v3119_v19  ;;  %v1919_v19 = vld [vmem:[#allocation4 + $0x220] sm:$0xff] }
 0x55a   :  { %2335 = vmatpush1.bf16.msra.mxu0 %v2021_v15  ;;  %2172 = vmatprep.subr.bf16.mxu1 %v1896_v32  ;;  %v3319_v15 = vpack.c.bf16 %v3159_v13, %v3159_v13  ;;  %v1917_v32 = vld [vmem:[#allocation4 + $0x210] sm:$0xff]  ;;  %v2047_v13 = vld [vmem:[#allocation4 + $0x620] sm:$0xff] }
 0x55b   :  { %2336 = vmatprep.subr.bf16.mxu0 %v2024_v33  ;;  %v2045_v33 = vld [vmem:[#allocation4 + $0x610] sm:$0xff] }
 0x55d   :  { %2173 = vmatpush1.bf16.msra.mxu1 %v1895_v36  ;;  %v1920_v36 = vld [vmem:[#allocation4 + $0x228] sm:$0xff] }
 0x55e   :  { %2337 = vmatpush1.bf16.msra.mxu0 %v2023_v37  ;;  %2174 = vmatprep.subr.bf16.mxu1 %v1898_v38  ;;  %v2048_v37 = vld [vmem:[#allocation4 + $0x628] sm:$0xff]  ;;  %v3320_v38 = vpack.c.bf16 %v3145_v61, %v3145_v61 }
 0x55f   :  { %2338 = vmatprep.subr.bf16.mxu0 %v2026_v21  ;;  %v1922_v21 = vld [vmem:[#allocation4 + $0x238] sm:$0xff]  ;;  %v1924_v61 = vld [vmem:[#allocation4 + $0x248] sm:$0xff] }
 0x561   :  { %2175 = vmatpush1.bf16.msra.mxu1 %v1897_v40  ;;  %v2050_v40 = vld [vmem:[#allocation4 + $0x638] sm:$0xff] }
 0x562   :  { %2339 = vmatpush1.bf16.msra.mxu0 %v2025_v35  ;;  %2176 = vmatprep.subr.bf16.mxu1 %v1900_v47  ;;  %v1921_v35 = vld [vmem:[#allocation4 + $0x230] sm:$0xff] }
 0x563   :  { %2340 = vmatprep.subr.bf16.mxu0 %v2028_v46  ;;  %v2049_v47 = vld [vmem:[#allocation4 + $0x630] sm:$0xff]  ;;  %v2052_v46 = vld [vmem:[#allocation4 + $0x648] sm:$0xff] }
 0x565   :  { %2177 = vmatpush1.bf16.msra.mxu1 %v1899_v63  ;;  %v1926_v63 = vld [vmem:[#allocation4 + $0x258] sm:$0xff] }
 0x566   :  { %2341 = vmatpush1.bf16.msra.mxu0 %v2027_v14  ;;  %2178 = vmatprep.subr.bf16.mxu1 %v1902_v49  ;;  %v2054_v14 = vld [vmem:[#allocation4 + $0x658] sm:$0xff]  ;;  %v1925_v49 = vld [vmem:[#allocation4 + $0x250] sm:$0xff] }
 0x567   :  { %2342 = vmatprep.subr.bf16.mxu0 %v2030_v50  ;;  %v2053_v50 = vld [vmem:[#allocation4 + $0x650] sm:$0xff] }
 0x569   :  { %2179 = vmatpush1.bf16.msra.mxu1 %v1901_v7  ;;  %v1928_v7 = vld [vmem:[#allocation4 + $0x268] sm:$0xff] }
 0x56a   :  { %2343 = vmatpush1.bf16.msra.mxu0 %v2029_v0  ;;  %2180 = vmatprep.subr.bf16.mxu1 %v1904_v1  ;;  %v2056_v0 = vld [vmem:[#allocation4 + $0x668] sm:$0xff]  ;;  %v1927_v1 = vld [vmem:[#allocation4 + $0x260] sm:$0xff] }
 0x56b   :  { %2344 = vmatprep.subr.bf16.mxu0 %v2032_v27  ;;  %v2055_v27 = vld [vmem:[#allocation4 + $0x660] sm:$0xff] }
 0x56d   :  { %2181 = vmatpush1.bf16.msra.mxu1 %v1903_v29  ;;  %v1930_v29 = vld [vmem:[#allocation4 + $0x278] sm:$0xff] }
 0x56e   :  { %2345 = vmatpush1.bf16.msra.mxu0 %v2031_v28  ;;  %2182 = vmatprep.subr.bf16.mxu1 %v1906_v5  ;;  %v2058_v28 = vld [vmem:[#allocation4 + $0x678] sm:$0xff]  ;;  %v1929_v5 = vld [vmem:[#allocation4 + $0x270] sm:$0xff] }
 0x56f   :  { %2346 = vmatprep.subr.bf16.mxu0 %v2034_v6  ;;  %v2057_v6 = vld [vmem:[#allocation4 + $0x670] sm:$0xff] }
 0x571   :  { %2183 = vmatpush1.bf16.msra.mxu1 %v1905_v8  ;;  %v1932_v8 = vld [vmem:[#allocation4 + $0x288] sm:$0xff] }
 0x572   :  { %2347 = vmatpush1.bf16.msra.mxu0 %v2033_v3  ;;  %2184 = vmatprep.subr.bf16.mxu1 %v1908_v51  ;;  %v2060_v3 = vld [vmem:[#allocation4 + $0x688] sm:$0xff]  ;;  %v1931_v51 = vld [vmem:[#allocation4 + $0x280] sm:$0xff] }
 0x573   :  { %2348 = vmatprep.subr.bf16.mxu0 %v2036_v53  ;;  %v2059_v53 = vld [vmem:[#allocation4 + $0x680] sm:$0xff] }
 0x575   :  { %2185 = vmatpush1.bf16.msra.mxu1 %v1907_v52  ;;  %v1934_v52 = vld [vmem:[#allocation4 + $0x298] sm:$0xff] }
 0x576   :  { %2349 = vmatpush1.bf16.msra.mxu0 %v2035_v54  ;;  %2186 = vmatprep.subr.bf16.mxu1 %v1910_v11  ;;  %v2062_v54 = vld [vmem:[#allocation4 + $0x698] sm:$0xff]  ;;  %v1933_v11 = vld [vmem:[#allocation4 + $0x290] sm:$0xff] }
 0x577   :  { %2350 = vmatprep.subr.bf16.mxu0 %v2038_v39  ;;  %v2061_v39 = vld [vmem:[#allocation4 + $0x690] sm:$0xff] }
 0x579   :  { %2187 = vmatpush1.bf16.msra.mxu1 %v1909_v41  ;;  %v1936_v41 = vld [vmem:[#allocation4 + $0x2a8] sm:$0xff] }
 0x57a   :  { %2351 = vmatpush1.bf16.msra.mxu0 %v2037_v42  ;;  %2188 = vmatprep.subr.bf16.mxu1 %v1912_v43  ;;  %v2064_v42 = vld [vmem:[#allocation4 + $0x6a8] sm:$0xff]  ;;  %v1935_v43 = vld [vmem:[#allocation4 + $0x2a0] sm:$0xff] }
 0x57b   :  { %2352 = vmatprep.subr.bf16.mxu0 %v2040_v18  ;;  %v2063_v18 = vld [vmem:[#allocation4 + $0x6a0] sm:$0xff] }
 0x57d   :  { %2189 = vmatpush1.bf16.msra.mxu1 %v1911_v30  ;;  %v1938_v30 = vld [vmem:[#allocation4 + $0x2b8] sm:$0xff] }
 0x57e   :  { %2353 = vmatpush1.bf16.msra.mxu0 %v2039_v44  ;;  %2190 = vmatprep.subr.bf16.mxu1 %v1914_v34  ;;  %v2066_v44 = vld [vmem:[#allocation4 + $0x6b8] sm:$0xff]  ;;  %v1937_v34 = vld [vmem:[#allocation4 + $0x2b0] sm:$0xff] }
 0x57f   :  { %2354 = vmatprep.subr.bf16.mxu0 %v2042_v26  ;;  %v2065_v26 = vld [vmem:[#allocation4 + $0x6b0] sm:$0xff] }
 0x581   :  { %2191 = vmatpush1.bf16.msra.mxu1 %v1913_v17  ;;  %v1940_v17 = vld [vmem:[#allocation4 + $0x2c8] sm:$0xff] }
 0x582   :  { %2355 = vmatpush1.bf16.msra.mxu0 %v2041_v57  ;;  %2201 = vmatprep.subr.bf16.mxu1 %v1916_v48  ;;  %v2068_v57 = vld [vmem:[#allocation4 + $0x6c8] sm:$0xff]  ;;  %v1939_v48 = vld [vmem:[#allocation4 + $0x2c0] sm:$0xff] }
 0x583   :  { %2365 = vmatprep.subr.bf16.mxu0 %v2044_v58  ;;  %v2067_v58 = vld [vmem:[#allocation4 + $0x6c0] sm:$0xff] }
 0x584   :  { %2193 = vmatmul.mubr.bf16.vlgmr.msra.gmra.mrb[52].mxu1 %v3318_v4  ;;  %v1944_v4 = vld [vmem:[#allocation4 + $0x2e8] sm:$0xff] }
 0x585   :  { %2357 = vmatmul.mubr.bf16.vlgmr.msra.gmra.mrb[52].mxu0 %v3319_v15  ;;  %2202 = vmatpush1.bf16.msra.mxu1 %v1915_v20  ;;  %v1942_v20 = vld [vmem:[#allocation4 + $0x2d8] sm:$0xff]  ;;  %v2072_v15 = vld [vmem:[#allocation4 + $0x6e8] sm:$0xff] }
 0x586   :  { %2366 = vmatpush1.bf16.msra.mxu0 %v2043_v10  ;;  %2203 = vmatprep.subr.bf16.mxu1 %v1918_v25  ;;  %v2070_v10 = vld [vmem:[#allocation4 + $0x6d8] sm:$0xff]  ;;  %v1941_v25 = vld [vmem:[#allocation4 + $0x2d0] sm:$0xff] }
 0x587   :  { %2367 = vmatprep.subr.bf16.mxu0 %v2046_v60  ;;  %2233 = vmatprep.mubr.bf16.mxu1 %v3320_v38  ;;  %v2069_v60 = vld [vmem:[#allocation4 + $0x6d0] sm:$0xff] }
 0x588   :  { %2397 = vmatprep.mubr.bf16.mxu0 %v1385_v24  ;;  %v2051_v24 = vld [vmem:[#allocation4 + $0x640] sm:$0xff]  ;;  %v1945_v38 = vld [vmem:[#allocation4 + $0x2f0] sm:$0xff] }
 0x589   :  { %2204 = vmatpush1.bf16.msra.mxu1 %v1917_v32  ;;  %v1943_v32 = vld [vmem:[#allocation4 + $0x2e0] sm:$0xff] }
 0x58a   :  { %2368 = vmatpush1.bf16.msra.mxu0 %v2045_v33  ;;  %2205 = vmatprep.subr.bf16.mxu1 %v1920_v36  ;;  %v2071_v33 = vld [vmem:[#allocation4 + $0x6e0] sm:$0xff]  ;;  %v1946_v36 = vld [vmem:[#allocation4 + $0x2f8] sm:$0xff] }
 0x58b   :  { %2369 = vmatprep.subr.bf16.mxu0 %v2048_v37  ;;  %v2074_v37 = vld [vmem:[#allocation4 + $0x6f8] sm:$0xff] }
 0x58d   :  { %2206 = vmatpush1.bf16.msra.mxu1 %v1919_v19  ;;  %v2073_v19 = vld [vmem:[#allocation4 + $0x6f0] sm:$0xff] }
 0x58e   :  { %2370 = vmatpush1.bf16.msra.mxu0 %v2047_v13  ;;  %2207 = vmatprep.subr.bf16.mxu1 %v1922_v21  ;;  %v1948_v13 = vld [vmem:[#allocation4 + $0x308] sm:$0xff] }
 0x58f   :  { %2371 = vmatprep.subr.bf16.mxu0 %v2050_v40  ;;  %v2076_v21 = vld [vmem:[#allocation4 + $0x708] sm:$0xff]  ;;  %v1947_v40 = vld [vmem:[#allocation4 + $0x300] sm:$0xff] }
 0x591   :  { %2208 = vmatpush1.bf16.msra.mxu1 %v1921_v35  ;;  %v2075_v35 = vld [vmem:[#allocation4 + $0x700] sm:$0xff] }
 0x592   :  { %2372 = vmatpush1.bf16.msra.mxu0 %v2049_v47  ;;  %2209 = vmatprep.subr.bf16.mxu1 %v1924_v61  ;;  %v1950_v47 = vld [vmem:[#allocation4 + $0x318] sm:$0xff] }
 0x593   :  { %2373 = vmatprep.subr.bf16.mxu0 %v2052_v46  ;;  %v2078_v61 = vld [vmem:[#allocation4 + $0x718] sm:$0xff]  ;;  %v3321_v46 = vpack.c.bf16 %v3137_v55, %v3137_v55  ;;  %v1951_v55 = vld [vmem:[#allocation4 + $0x320] sm:$0xff] }
 0x595   :  { %2210 = vmatpush1.bf16.msra.mxu1 %v1923_v59  ;;  %v1949_v59 = vld [vmem:[#allocation4 + $0x310] sm:$0xff] }
 0x596   :  { %2374 = vmatpush1.bf16.msra.mxu0 %v2051_v24  ;;  %2211 = vmatprep.subr.bf16.mxu1 %v1926_v63  ;;  %v2077_v24 = vld [vmem:[#allocation4 + $0x710] sm:$0xff]  ;;  %v1952_v63 = vld [vmem:[#allocation4 + $0x328] sm:$0xff] }
 0x597   :  { %2375 = vmatprep.subr.bf16.mxu0 %v2054_v14  ;;  %v2080_v14 = vld [vmem:[#allocation4 + $0x728] sm:$0xff] }
 0x599   :  { %2212 = vmatpush1.bf16.msra.mxu1 %v1925_v49  ;;  %v3322_v49 = vpack.c.bf16 %v3147_v2, %v3147_v2  ;;  %v1956_v2 = vld [vmem:[#allocation4 + $0x348] sm:$0xff] }
 0x59a   :  { %2376 = vmatpush1.bf16.msra.mxu0 %v2053_v50  ;;  %2213 = vmatprep.subr.bf16.mxu1 %v1928_v7  ;;  %v2082_v50 = vld [vmem:[#allocation4 + $0x738] sm:$0xff]  ;;  %v1953_v7 = vld [vmem:[#allocation4 + $0x330] sm:$0xff] }
 0x59b   :  { %2377 = vmatprep.subr.bf16.mxu0 %v2056_v0  ;;  %v2081_v0 = vld [vmem:[#allocation4 + $0x730] sm:$0xff] }
 0x59d   :  { %2214 = vmatpush1.bf16.msra.mxu1 %v1927_v1  ;;  %v2084_v1 = vld [vmem:[#allocation4 + $0x748] sm:$0xff] }
 0x59e   :  { %2378 = vmatpush1.bf16.msra.mxu0 %v2055_v27  ;;  %2215 = vmatprep.subr.bf16.mxu1 %v1930_v29  ;;  %v1958_v27 = vld [vmem:[#allocation4 + $0x358] sm:$0xff] }
 0x59f   :  { %2379 = vmatprep.subr.bf16.mxu0 %v2058_v28  ;;  %v2086_v29 = vld [vmem:[#allocation4 + $0x758] sm:$0xff]  ;;  %v1957_v28 = vld [vmem:[#allocation4 + $0x350] sm:$0xff] }
 0x5a1   :  { %2216 = vmatpush1.bf16.msra.mxu1 %v1929_v5  ;;  %v2085_v5 = vld [vmem:[#allocation4 + $0x750] sm:$0xff] }
 0x5a2   :  { %2380 = vmatpush1.bf16.msra.mxu0 %v2057_v6  ;;  %2217 = vmatprep.subr.bf16.mxu1 %v1932_v8  ;;  %v1960_v6 = vld [vmem:[#allocation4 + $0x368] sm:$0xff] }
 0x5a3   :  { %2381 = vmatprep.subr.bf16.mxu0 %v2060_v3  ;;  %v2088_v8 = vld [vmem:[#allocation4 + $0x768] sm:$0xff]  ;;  %v1959_v3 = vld [vmem:[#allocation4 + $0x360] sm:$0xff] }
 0x5a5   :  { %2218 = vmatpush1.bf16.msra.mxu1 %v1931_v51  ;;  %v2087_v51 = vld [vmem:[#allocation4 + $0x760] sm:$0xff] }
 0x5a6   :  { %2382 = vmatpush1.bf16.msra.mxu0 %v2059_v53  ;;  %2219 = vmatprep.subr.bf16.mxu1 %v1934_v52  ;;  %v1962_v53 = vld [vmem:[#allocation4 + $0x378] sm:$0xff] }
 0x5a7   :  { %2383 = vmatprep.subr.bf16.mxu0 %v2062_v54  ;;  %v2090_v52 = vld [vmem:[#allocation4 + $0x778] sm:$0xff]  ;;  %v1961_v54 = vld [vmem:[#allocation4 + $0x370] sm:$0xff] }
 0x5a9   :  { %2220 = vmatpush1.bf16.msra.mxu1 %v1933_v11  ;;  %v2089_v11 = vld [vmem:[#allocation4 + $0x770] sm:$0xff] }
 0x5aa   :  { %2384 = vmatpush1.bf16.msra.mxu0 %v2061_v39  ;;  %2221 = vmatprep.subr.bf16.mxu1 %v1936_v41  ;;  %v1964_v39 = vld [vmem:[#allocation4 + $0x388] sm:$0xff] }
 0x5ab   :  { %2385 = vmatprep.subr.bf16.mxu0 %v2064_v42  ;;  %v2092_v41 = vld [vmem:[#allocation4 + $0x788] sm:$0xff]  ;;  %v1963_v42 = vld [vmem:[#allocation4 + $0x380] sm:$0xff] }
 0x5ad   :  { %2222 = vmatpush1.bf16.msra.mxu1 %v1935_v43  ;;  %v2091_v43 = vld [vmem:[#allocation4 + $0x780] sm:$0xff] }
 0x5ae   :  { %2386 = vmatpush1.bf16.msra.mxu0 %v2063_v18  ;;  %2223 = vmatprep.subr.bf16.mxu1 %v1938_v30  ;;  %v1966_v18 = vld [vmem:[#allocation4 + $0x398] sm:$0xff] }
 0x5af   :  { %2387 = vmatprep.subr.bf16.mxu0 %v2066_v44  ;;  %v2094_v30 = vld [vmem:[#allocation4 + $0x798] sm:$0xff]  ;;  %v1965_v44 = vld [vmem:[#allocation4 + $0x390] sm:$0xff] }
 0x5b1   :  { %2224 = vmatpush1.bf16.msra.mxu1 %v1937_v34  ;;  %v2093_v34 = vld [vmem:[#allocation4 + $0x790] sm:$0xff] }
 0x5b2   :  { %2388 = vmatpush1.bf16.msra.mxu0 %v2065_v26  ;;  %2225 = vmatprep.subr.bf16.mxu1 %v1940_v17  ;;  %v1968_v26 = vld [vmem:[#allocation4 + $0x3a8] sm:$0xff] }
 0x5b3   :  { %2389 = vmatprep.subr.bf16.mxu0 %v2068_v57  ;;  %v2096_v17 = vld [vmem:[#allocation4 + $0x7a8] sm:$0xff]  ;;  %v1967_v57 = vld [vmem:[#allocation4 + $0x3a0] sm:$0xff] }
 0x5b5   :  { %2226 = vmatpush1.bf16.msra.mxu1 %v1939_v48  ;;  %v2095_v48 = vld [vmem:[#allocation4 + $0x7a0] sm:$0xff] }
 0x5b6   :  { %2390 = vmatpush1.bf16.msra.mxu0 %v2067_v58  ;;  %2227 = vmatprep.subr.bf16.mxu1 %v1942_v20  ;;  %v1970_v58 = vld [vmem:[#allocation4 + $0x3b8] sm:$0xff] }
 0x5b7   :  { %2391 = vmatprep.subr.bf16.mxu0 %v2070_v10  ;;  %v2098_v20 = vld [vmem:[#allocation4 + $0x7b8] sm:$0xff]  ;;  %v1969_v10 = vld [vmem:[#allocation4 + $0x3b0] sm:$0xff] }
 0x5b9   :  { %2228 = vmatpush1.bf16.msra.mxu1 %v1941_v25  ;;  %v2097_v25 = vld [vmem:[#allocation4 + $0x7b0] sm:$0xff] }
 0x5ba   :  { %2392 = vmatpush1.bf16.msra.mxu0 %v2069_v60  ;;  %2229 = vmatprep.subr.bf16.mxu1 %v1944_v4  ;;  %v1972_v60 = vld [vmem:[#allocation4 + $0x3c8] sm:$0xff] }
 0x5bb   :  { %2393 = vmatprep.subr.bf16.mxu0 %v2072_v15  ;;  %v2100_v4 = vld [vmem:[#allocation4 + $0x7c8] sm:$0xff]  ;;  %v1971_v15 = vld [vmem:[#allocation4 + $0x3c0] sm:$0xff] }
 0x5bd   :  { %2230 = vmatpush1.bf16.msra.mxu1 %v1943_v32  ;;  %v2099_v32 = vld [vmem:[#allocation4 + $0x7c0] sm:$0xff] }
 0x5be   :  { %2394 = vmatpush1.bf16.msra.mxu0 %v2071_v33  ;;  %2231 = vmatprep.subr.bf16.mxu1 %v1946_v36  ;;  %v1974_v33 = vld [vmem:[#allocation4 + $0x3d8] sm:$0xff] }
 0x5bf   :  { %2395 = vmatprep.subr.bf16.mxu0 %v2074_v37  ;;  %v2102_v36 = vld [vmem:[#allocation4 + $0x7d8] sm:$0xff]  ;;  %v1973_v37 = vld [vmem:[#allocation4 + $0x3d0] sm:$0xff] }
 0x5c1   :  { %2232 = vmatpush1.bf16.msra.mxu1 %v1945_v38  ;;  %v2101_v38 = vld [vmem:[#allocation4 + $0x7d0] sm:$0xff] }
 0x5c2   :  { %2396 = vmatpush1.bf16.msra.mxu0 %v2073_v19  ;;  %2242 = vmatprep.subr.bf16.mxu1 %v1948_v13  ;;  %v1976_v19 = vld [vmem:[#allocation4 + $0x3e8] sm:$0xff] }
 0x5c3   :  { %2406 = vmatprep.subr.bf16.mxu0 %v2076_v21  ;;  %v2104_v13 = vld [vmem:[#allocation4 + $0x7e8] sm:$0xff]  ;;  %v1975_v21 = vld [vmem:[#allocation4 + $0x3e0] sm:$0xff] }
 0x5c4   :  { %2234 = vmatmul.mubr.bf16.vlgmr.msra.gmra.mrb[52].mxu1 %v3321_v46  ;;  %v2105_v46 = vld [vmem:[#allocation4 + $0x7f0] sm:$0xff] }
 0x5c5   :  { %2398 = vmatmul.mubr.bf16.vlgmr.msra.gmra.mrb[52].mxu0 %v1384_v56  ;;  %2243 = vmatpush1.bf16.msra.mxu1 %v1947_v40  ;;  %v1954_v56 = vld [vmem:[#allocation4 + $0x338] sm:$0xff]  ;;  %v2103_v40 = vld [vmem:[#allocation4 + $0x7e0] sm:$0xff] }
 0x5c6   :  { %2407 = vmatpush1.bf16.msra.mxu0 %v2075_v35  ;;  %2244 = vmatprep.subr.bf16.mxu1 %v1950_v47  ;;  %v1978_v35 = vld [vmem:[#allocation4 + $0x3f8] sm:$0xff] }
 0x5c7   :  { %2408 = vmatprep.subr.bf16.mxu0 %v2078_v61  ;;  %2274 = vmatprep.mubr.bf16.mxu1 %v3322_v49  ;;  %v2106_v47 = vld [vmem:[#allocation4 + $0x7f8] sm:$0xff]  ;;  %v1977_v61 = vld [vmem:[#allocation4 + $0x3f0] sm:$0xff] }
 0x5c8   :  { %2438 = vmatprep.mubr.bf16.mxu0 %v1387_v62  ;;  %v2083_v62 = vld [vmem:[#allocation4 + $0x740] sm:$0xff] }
 0x5c9   :  { %2245 = vmatpush1.bf16.msra.mxu1 %v1949_v59  ;;  %v3323_v59 = vpack.c.bf16 %v3139_v31, %v3139_v31 }
 0x5ca   :  { %2409 = vmatpush1.bf16.msra.mxu0 %v2077_v24  ;;  %2246 = vmatprep.subr.bf16.mxu1 %v1952_v63  ;;  %v2107_v24 = vld [vmem:[#allocation8 + $0x1] sm:$0x3] }
 0x5cb   :  { %2410 = vmatprep.subr.bf16.mxu0 %v2080_v14  ;;  %v2112_v63 = vrot.slane %v2107_v24, %v3017_v9  ;;  %v2116_v14 = vrot.slane %v2107_v24, %v3021_v12 }
 0x5cd   :  { %2247 = vmatpush1.bf16.msra.mxu1 %v1951_v55 }
 0x5ce   :  { %2411 = vmatpush1.bf16.msra.mxu0 %v2079_v23  ;;  %2248 = vmatprep.subr.bf16.mxu1 %v1954_v56 }
 0x5cf   :  { %2412 = vmatprep.subr.bf16.mxu0 %v2082_v50 }
 0x5d1   :  { %2249 = vmatpush1.bf16.msra.mxu1 %v1953_v7 }
 0x5d2   :  { %2413 = vmatpush1.bf16.msra.mxu0 %v2081_v0  ;;  %2250 = vmatprep.subr.bf16.mxu1 %v1956_v2 }
 0x5d3   :  { %2414 = vmatprep.subr.bf16.mxu0 %v2084_v1 }
 0x5d5   :  { %2251 = vmatpush1.bf16.msra.mxu1 %v1955_v16 }
 0x5d6   :  { %2415 = vmatpush1.bf16.msra.mxu0 %v2083_v62  ;;  %2252 = vmatprep.subr.bf16.mxu1 %v1958_v27 }
 0x5d7   :  { %2416 = vmatprep.subr.bf16.mxu0 %v2086_v29 }
 0x5d9   :  { %2253 = vmatpush1.bf16.msra.mxu1 %v1957_v28 }
 0x5da   :  { %2417 = vmatpush1.bf16.msra.mxu0 %v2085_v5  ;;  %2254 = vmatprep.subr.bf16.mxu1 %v1960_v6 }
 0x5db   :  { %2418 = vmatprep.subr.bf16.mxu0 %v2088_v8 }
 0x5dd   :  { %2255 = vmatpush1.bf16.msra.mxu1 %v1959_v3 }
 0x5de   :  { %2419 = vmatpush1.bf16.msra.mxu0 %v2087_v51  ;;  %2256 = vmatprep.subr.bf16.mxu1 %v1962_v53 }
 0x5df   :  { %2420 = vmatprep.subr.bf16.mxu0 %v2090_v52 }
 0x5e1   :  { %2257 = vmatpush1.bf16.msra.mxu1 %v1961_v54 }
 0x5e2   :  { %2421 = vmatpush1.bf16.msra.mxu0 %v2089_v11  ;;  %2258 = vmatprep.subr.bf16.mxu1 %v1964_v39 }
 0x5e3   :  { %2422 = vmatprep.subr.bf16.mxu0 %v2092_v41 }
 0x5e5   :  { %2259 = vmatpush1.bf16.msra.mxu1 %v1963_v42 }
 0x5e6   :  { %2423 = vmatpush1.bf16.msra.mxu0 %v2091_v43  ;;  %2260 = vmatprep.subr.bf16.mxu1 %v1966_v18 }
 0x5e7   :  { %2424 = vmatprep.subr.bf16.mxu0 %v2094_v30 }
 0x5e9   :  { %2261 = vmatpush1.bf16.msra.mxu1 %v1965_v44 }
 0x5ea   :  { %2425 = vmatpush1.bf16.msra.mxu0 %v2093_v34  ;;  %2262 = vmatprep.subr.bf16.mxu1 %v1968_v26 }
 0x5eb   :  { %2426 = vmatprep.subr.bf16.mxu0 %v2096_v17 }
 0x5ed   :  { %2263 = vmatpush1.bf16.msra.mxu1 %v1967_v57 }
 0x5ee   :  { %2427 = vmatpush1.bf16.msra.mxu0 %v2095_v48  ;;  %2264 = vmatprep.subr.bf16.mxu1 %v1970_v58 }
 0x5ef   :  { %2428 = vmatprep.subr.bf16.mxu0 %v2098_v20 }
 0x5f1   :  { %2265 = vmatpush1.bf16.msra.mxu1 %v1969_v10 }
 0x5f2   :  { %2429 = vmatpush1.bf16.msra.mxu0 %v2097_v25  ;;  %2266 = vmatprep.subr.bf16.mxu1 %v1972_v60 }
 0x5f3   :  { %2430 = vmatprep.subr.bf16.mxu0 %v2100_v4 }
 0x5f5   :  { %2267 = vmatpush1.bf16.msra.mxu1 %v1971_v15 }
 0x5f6   :  { %2431 = vmatpush1.bf16.msra.mxu0 %v2099_v32  ;;  %2268 = vmatprep.subr.bf16.mxu1 %v1974_v33 }
 0x5f7   :  { %2432 = vmatprep.subr.bf16.mxu0 %v2102_v36 }
 0x5f9   :  { %2269 = vmatpush1.bf16.msra.mxu1 %v1973_v37 }
 0x5fa   :  { %2433 = vmatpush1.bf16.msra.mxu0 %v2101_v38  ;;  %2270 = vmatprep.subr.bf16.mxu1 %v1976_v19 }
 0x5fb   :  { %2434 = vmatprep.subr.bf16.mxu0 %v2104_v13 }
 0x5fd   :  { %2271 = vmatpush1.bf16.msra.mxu1 %v1975_v21 }
 0x5fe   :  { %2435 = vmatpush1.bf16.msra.mxu0 %v2103_v40  ;;  %2272 = vmatprep.subr.bf16.mxu1 %v1978_v35 }
 0x5ff   :  { %2436 = vmatprep.subr.bf16.mxu0 %v2106_v47 }
 0x601   :  { %2273 = vmatpush1.bf16.msra.mxu1 %v1977_v61 }
 0x602   :  { %2437 = vmatpush1.bf16.msra.mxu0 %v2105_v46 }
 0x604   :  { %2275 = vmatmul.mubr.bf16.vlgmr.msra.gmra.mrb[52].mxu1 %v3323_v59 }
 0x605   :  { %2439 = vmatmul.mubr.bf16.vlgmr.msra.gmra.mrb[52].mxu0 %v1386_v22 }
 0x6d7   :  { %v2276_v49 = vpop.f32.mrb[52].mxu1 }
 0x6d8   :  { %v2440_v55 = vpop.f32.mrb[52].mxu0  ;;  %v2699_v23 = vadd.f32 %v2276_v49, %v2112_v63  ;;  %v2278_v56 = vpop.f32.mrb[53].mxu1 }
 0x6d9   :  { %v2442_v50 = vpop.f32.mrb[53].mxu0  ;;  %v2701_v7 = vadd.f32 %v2278_v56, %v2116_v14  ;;  %v2280_v0 = vpop.f32.mrb[54].mxu1 }
 0x6da   :  { %v2444_v2 = vpop.f32.mrb[54].mxu0  ;;  %v2700_v1 = vadd.f32 %v2699_v23, %v2440_v55  ;;  %v2281_v31 = vpop.f32.mrb[55].mxu1 }
 0x6db   :  { %v2445_v16 = vpop.f32.mrb[55].mxu0  ;;  %v2702_v62 = vadd.f32 %v2701_v7, %v2442_v50 }
 0x6dc   :  { %2447 = vst [vmem:[%s3308_s8 + $0x8] sm:$0xff] %v2700_v1 }
 0x6dd   :  { %2448 = vst [vmem:[%s3308_s8 + $0x10] sm:$0xff] %v2702_v62 }
 0x6de   :  { %2453 = vsyncpa [#allocation7], 1 }
 0x6df   :  { %2454 = vsyncpa [#allocation9], 1 }
 0x6e0   :  { %2455 = vsyncmov [#allocation5] }
 0x6e3   :  { %s2456_s25 = vpop.sfrf %2455 }
 0x6e4   :  { %p2501_p10 = scmp.ne.s32.totalorder %s2456_s25, 0 }
 0x6e6   :  { %2460 = shalt.err (%p2501_p10)  }
 0x6e7   :  { %2462 = vsyncmov [#allocation5 + $0x1] }
 0x6ea   :  { %s2463_s26 = vpop.sfrf %2462 }
 0x6eb   :  { %p2502_p11 = scmp.ne.s32.totalorder %s2463_s26, 0 }
 0x6ed   :  { %2467 = shalt.err (%p2502_p11)  }
 0x6ee   :  { %2469 = vsyncmov [#allocation5 + $0x2] }
 0x6f1   :  { %s2470_s27 = vpop.sfrf %2469 }
 0x6f2   :  { %p2503_p12 = scmp.ne.s32.totalorder %s2470_s27, 0 }
 0x6f4   :  { %2474 = shalt.err (%p2503_p12)  }

</bundles_post_ra>
